<compile_context>
chip_gen: v7x
topology: tpu7x:2x2x1
jax: 0.10.0
libtpu: 0.0.40
codegen_flags: <defaults>
</compile_context>

<pallas_src>
import functools

import numpy as np

import jax
import jax.numpy as jnp
from jax.experimental import pallas as pl
from jax.experimental.pallas import tpu as pltpu

KERNEL_SIZE = 4
POOLSIZE = 2
PAD = 2
LANE = 128


def _ceil_to(a, m):
    return -(-a // m) * m


# ----------------------------------------------------------------------------
# Constant prep (hoisted out of the forward path)
# ----------------------------------------------------------------------------
def prepare_params(params, in_h, in_w, tb):
    """Host-side constant prep for a TB-image block.

    Geometry note (review correctness concern): with PAD=2, K=4, stride=1 the
    conv output is N+1 wide/tall and MaxPool2d(2) discards the last row/col,
    so only the first N conv outputs are ever needed.  Asserted below.
    """
    w1 = np.asarray(params["w1"], np.float32)   # (c1, c0, 4, 4)
    w2 = np.asarray(params["w2"], np.float32)   # (c2, c1, 4, 4)
    wl = np.asarray(params["wl"], np.float32)   # (out_f, c2*hp2*wp2)  CHW flatten
    b1 = np.asarray(params["b1"], np.float32)
    b2 = np.asarray(params["b2"], np.float32)
    bl = np.asarray(params["bl"], np.float32)

    c1, c0 = w1.shape[:2]
    c2 = w2.shape[0]
    out_f = wl.shape[0]
    H, W = in_h, in_w
    hp1, wp1 = H // POOLSIZE, W // POOLSIZE
    hp2, wp2 = hp1 // POOLSIZE, wp1 // POOLSIZE

    assert 2 * PAD - KERNEL_SIZE + 1 == 1, "conv/pool geometry assumption broken"
    assert H % 2 == 0 and W % 2 == 0 and hp1 % 2 == 0 and wp1 % 2 == 0

    wpad = W + 2 * PAD
    lane0 = wpad * c0                    # packed conv1 input lane width (80)
    lane0p = _ceil_to(lane0, LANE)       # padded to a lane tile (128)
    lane1 = wp1 * c1                     # packed conv2 input lane width (128)
    out_fp = _ceil_to(out_f, LANE)

    # conv1 weight slabs: R1[kh*lane0p + xx*c0 + c, x*c1 + co] = w1[co,c,kh,xx-x]
    R1 = np.zeros((KERNEL_SIZE * lane0p, W * c1), np.float32)
    for kh in range(KERNEL_SIZE):
        for x in range(W):
            for kw in range(KERNEL_SIZE):
                xx = x + kw                       # padded column index
                for c in range(c0):
                    R1[kh * lane0p + xx * c0 + c, x * c1:(x + 1) * c1] = w1[:, c, kh, kw]
    b1t = np.tile(b1, W).reshape(1, W * c1)

    # conv2 weight slabs (width zero-padding folded in as absent rows)
    R2 = np.zeros((KERNEL_SIZE * lane1, wp1 * c2), np.float32)
    for kh in range(KERNEL_SIZE):
        for j in range(wp1):
            for kw in range(KERNEL_SIZE):
                jj = j - PAD + kw                 # un-padded column index
                if 0 <= jj < wp1:
                    for c in range(c1):
                        R2[kh * lane1 + jj * c1 + c, j * c2:(j + 1) * c2] = w2[:, c, kh, kw]
    b2t = np.tile(b2, wp1).reshape(1, wp1 * c2)

    # pool1: exact one-hot selection, lane-phase (both phases side by side)
    # then row-phase.
    CS1 = np.zeros((W * c1, 2 * wp1 * c1), np.float32)
    for bb in range(POOLSIZE):
        for j in range(wp1):
            for c in range(c1):
                CS1[(POOLSIZE * j + bb) * c1 + c, bb * wp1 * c1 + j * c1 + c] = 1.0
    RS1 = np.zeros((POOLSIZE * tb * hp1, tb * H), np.float32)
    for a in range(POOLSIZE):
        for b in range(tb):
            for i in range(hp1):
                RS1[a * tb * hp1 + b * hp1 + i, b * H + POOLSIZE * i + a] = 1.0

    # pool2
    CS2 = np.zeros((wp1 * c2, 2 * wp2 * c2), np.float32)
    for bb in range(POOLSIZE):
        for j in range(wp2):
            for c in range(c2):
                CS2[(POOLSIZE * j + bb) * c2 + c, bb * wp2 * c2 + j * c2 + c] = 1.0
    RS2 = np.zeros((POOLSIZE * tb * hp2, tb * hp1), np.float32)
    for a in range(POOLSIZE):
        for b in range(tb):
            for i in range(hp2):
                RS2[a * tb * hp2 + b * hp2 + i, b * hp1 + POOLSIZE * i + a] = 1.0

    # flatten: place pooled row ii into lane block ii (mask + row collapse)
    fl = hp2 * wp2 * c2
    MASK2 = np.zeros((tb * hp2, fl), np.float32)
    for b in range(tb):
        for ii in range(hp2):
            MASK2[b * hp2 + ii, ii * (wp2 * c2):(ii + 1) * (wp2 * c2)] = 1.0
    RC = np.zeros((tb, tb * hp2), np.float32)
    for b in range(tb):
        RC[b, b * hp2:(b + 1) * hp2] = 1.0

    # linear: our flat lane order is (ii, jj, co); PyTorch .view flatten is CHW.
    # Also pad the output features to a full lane tile (lane-dense store).
    WLB = np.zeros((fl, out_fp), np.float32)
    for ii in range(hp2):
        for jj in range(wp2):
            for co in range(c2):
                WLB[ii * (wp2 * c2) + jj * c2 + co, :out_f] = \
                    wl[:, co * hp2 * wp2 + ii * wp2 + jj]
    BLP = np.zeros((1, out_fp), np.float32)
    BLP[0, :out_f] = bl

    consts = dict(R1=R1, b1t=b1t, CS1=CS1, RS1=RS1,
                  R2=R2, b2t=b2t, CS2=CS2, RS2=RS2,
                  MASK2=MASK2, RC=RC, WLB=WLB, BLP=BLP)
    return {k: jnp.asarray(v) for k, v in consts.items()}


# ----------------------------------------------------------------------------
# Fused Pallas kernel: conv1+relu+pool -> conv2+relu+pool -> flatten -> linear
# ----------------------------------------------------------------------------
def _fused_cnn(xpk, c, *, tb, H, W, c1, c2, out_fp):
    Bp, hpad, lane0p = xpk.shape
    hp1, wp1 = H // POOLSIZE, W // POOLSIZE
    hp2, wp2 = hp1 // POOLSIZE, wp1 // POOLSIZE
    lane1 = wp1 * c1            # conv2 input packed lane width
    pc2 = wp2 * c2              # pool2 output lane width

    def kernel(x_ref, r1_ref, b1_ref, cs1_ref, rs1_ref,
               r2_ref, b2_ref, cs2_ref, rs2_ref,
               m2_ref, rc_ref, wl_ref, bl_ref,
               o_ref, h1p_ref):
        f32 = jnp.float32
        dot = lambda a, b: jnp.dot(a, b, preferred_element_type=f32)

        # ---- conv1: 4 row-shifted lane-packed slabs, one MXU matmul ----
        slabs = [x_ref[:, pl.ds(kh, H), :].reshape(tb * H, lane0p)
                 for kh in range(KERNEL_SIZE)]
        cols1 = jnp.concatenate(slabs, axis=1)                 # (tb*H, 4*lane0p)
        a1 = jnp.maximum(dot(cols1, r1_ref[...]) + b1_ref[...], 0.0)  # (tb*H, W*c1)

        # ---- pool1 (2x2 max): lane phase + row phase, exact selections ----
        y1 = dot(a1, cs1_ref[...])                             # (tb*H, 2*lane1)
        z1 = jnp.maximum(y1[:, :lane1], y1[:, lane1:])         # (tb*H, lane1)
        w1p = dot(rs1_ref[...], z1)                            # (2*tb*hp1, lane1)
        p1 = jnp.maximum(w1p[:tb * hp1, :], w1p[tb * hp1:, :])  # (tb*hp1, lane1)

        # ---- stage conv2 input: row halo only (lanes stay packed (j, c1)) ----
        h1p_ref[:, pl.ds(0, PAD), :] = jnp.zeros((tb, PAD, lane1), f32)
        h1p_ref[:, pl.ds(PAD + hp1, PAD), :] = jnp.zeros((tb, PAD, lane1), f32)
        h1p_ref[:, pl.ds(PAD, hp1), :] = p1.reshape(tb, hp1, lane1)

        # ---- conv2: same slab scheme, one matmul ----
        slabs2 = [h1p_ref[:, pl.ds(kh, hp1), :].reshape(tb * hp1, lane1)
                  for kh in range(KERNEL_SIZE)]
        cols2 = jnp.concatenate(slabs2, axis=1)                # (tb*hp1, 4*lane1)
        a2 = jnp.maximum(dot(cols2, r2_ref[...]) + b2_ref[...], 0.0)  # (tb*hp1, wp1*c2)

        # ---- pool2 ----
        y2 = dot(a2, cs2_ref[...])                             # (tb*hp1, 2*pc2)
        z2 = jnp.maximum(y2[:, :pc2], y2[:, pc2:])             # (tb*hp1, pc2)
        w2p = dot(rs2_ref[...], z2)                            # (2*tb*hp2, pc2)
        p2 = jnp.maximum(w2p[:tb * hp2, :], w2p[tb * hp2:, :])  # (tb*hp2, pc2)

        # ---- flatten (mask + row collapse) + linear, lane-dense output ----
        vt = jnp.concatenate([p2] * hp2, axis=1)               # (tb*hp2, hp2*pc2)
        flat = dot(rc_ref[...], vt * m2_ref[...])              # (tb, hp2*wp2*c2)
        o_ref[...] = (dot(flat, wl_ref[...]) + bl_ref[...]).astype(o_ref.dtype)

    def full(arr):
        nd = arr.ndim
        return pl.BlockSpec(arr.shape, lambda g, _nd=nd: (0,) * _nd)

    consts = [c["R1"], c["b1t"], c["CS1"], c["RS1"],
              c["R2"], c["b2t"], c["CS2"], c["RS2"],
              c["MASK2"], c["RC"], c["WLB"], c["BLP"]]

    # NOTE: on v7x, pltpu.CORE_PARALLEL on this axis would split batch blocks
    # across the two TensorCores; "parallel" is kept here for portability.
    return pl.pallas_call(
        kernel,
        out_shape=jax.ShapeDtypeStruct((Bp, out_fp), jnp.float32),
        grid=(Bp // tb,),
        in_specs=[pl.BlockSpec((tb, hpad, lane0p), lambda g: (g, 0, 0))]
                 + [full(a) for a in consts],
        out_specs=pl.BlockSpec((tb, out_fp), lambda g: (g, 0)),
        scratch_shapes=[pltpu.VMEM((tb, hp1 + 2 * PAD, lane1), jnp.float32)],
        compiler_params=pltpu.CompilerParams(
            dimension_semantics=("parallel",)),
    )(xpk, *consts)


@functools.partial(jax.jit, static_argnames=("tb", "out_f"))
def cnn_forward(x_nchw, prep, *, tb, out_f):
    B, c0, H, W = x_nchw.shape
    Bp = _ceil_to(B, tb)
    # Output block is (tb, 128): its second-minor dim must be a multiple of 8
    # unless it spans the whole (padded) batch.
    assert Bp == tb or tb % 8 == 0, "tb must equal the padded batch or be a multiple of 8"

    x = jnp.transpose(x_nchw, (0, 2, 3, 1)).astype(jnp.float32)         # NHWC
    x = jnp.pad(x, ((0, Bp - B), (PAD, PAD), (PAD, PAD), (0, 0)))
    lane0 = (W + 2 * PAD) * c0
    lane0p = _ceil_to(lane0, LANE)
    xpk = x.reshape(Bp, H + 2 * PAD, lane0)                              # pack (x, c) into lanes
    xpk = jnp.pad(xpk, ((0, 0), (0, 0), (0, lane0p - lane0)))

    c1 = prep["b1t"].shape[1] // W
    c2 = prep["b2t"].shape[1] // (W // POOLSIZE)
    out_fp = prep["WLB"].shape[1]

    out = _fused_cnn(xpk, prep, tb=tb, H=H, W=W, c1=c1, c2=c2, out_fp=out_fp)
    return out[:B, :out_f]


# ----------------------------------------------------------------------------
# Pure-JAX reference (NCHW, same semantics as the PyTorch module)
# ----------------------------------------------------------------------------
def reference(x_nchw, params):
    def block(y, w, b):
        y = jax.lax.conv_general_dilated(
            y, w, (1, 1), ((PAD, PAD), (PAD, PAD)),
            dimension_numbers=("NCHW", "OIHW", "NCHW"),
        )
        y = y + b[None, :, None, None]
        y = jnp.maximum(y, 0.0)
        return jax.lax.reduce_window(
            y, -jnp.inf, jax.lax.max,
            (1, 1, POOLSIZE, POOLSIZE), (1, 1, POOLSIZE, POOLSIZE), "VALID",
        )

    y = block(x_nchw.astype(jnp.float32), params["w1"], params["b1"])
    y = block(y, params["w2"], params["b2"])
    flat = y.reshape(y.shape[0], -1)  # CHW flatten (PyTorch .view)
    return flat @ params["wl"].T + params["bl"]


if __name__ == "__main__":
    # in_feature=4, 16x16 input, out_feature=10 (matches the module defaults)
    B, Cin, H, W = 2, 4, 16, 16
    out_feature = 10
    h_out = H // POOLSIZE // POOLSIZE
    w_out = W // POOLSIZE // POOLSIZE

    key = jax.random.PRNGKey(0)
    kx, k1, k2, k3, k4, k5, k6 = jax.random.split(key, 7)
    params = {
        "w1": jax.random.normal(k1, (16, Cin, KERNEL_SIZE, KERNEL_SIZE), jnp.float32) * 0.1,
        "b1": jax.random.normal(k2, (16,), jnp.float32) * 0.1,
        "w2": jax.random.normal(k3, (32, 16, KERNEL_SIZE, KERNEL_SIZE), jnp.float32) * 0.05,
        "b2": jax.random.normal(k4, (32,), jnp.float32) * 0.05,
        "wl": jax.random.normal(k5, (out_feature, 32 * h_out * w_out), jnp.float32) * 0.05,
        "bl": jax.random.normal(k6, (out_feature,), jnp.float32) * 0.05,
    }
    x = jax.random.normal(kx, (B, Cin, H, W), jnp.float32)

    TB = B                                      # whole batch per grid step
    prep = prepare_params(params, H, W, tb=TB)  # hoisted constant layout transforms

    out = cnn_forward(x, prep, tb=TB, out_f=out_feature)
    out = jax.block_until_ready(out)

    ref = reference(x, params)
    assert out.shape == (B, out_feature), out.shape
    assert jnp.allclose(out, ref, rtol=1e-4, atol=1e-4), (
        f"max abs err {jnp.max(jnp.abs(out - ref))}"
    )
    print("KERNEL_OK")
</pallas_src>

<mosaic_0001>
module attributes {stable_mosaic.version = 11 : i64} {
  func.func @kernel(%arg0: i32, %arg1: memref<2x20x128xf32, #tpu.memory_space<vmem>>, %arg2: memref<512x256xf32, #tpu.memory_space<vmem>>, %arg3: memref<1x256xf32, #tpu.memory_space<vmem>>, %arg4: memref<256x256xf32, #tpu.memory_space<vmem>>, %arg5: memref<32x32xf32, #tpu.memory_space<vmem>>, %arg6: memref<512x256xf32, #tpu.memory_space<vmem>>, %arg7: memref<1x256xf32, #tpu.memory_space<vmem>>, %arg8: memref<256x256xf32, #tpu.memory_space<vmem>>, %arg9: memref<16x16xf32, #tpu.memory_space<vmem>>, %arg10: memref<8x512xf32, #tpu.memory_space<vmem>>, %arg11: memref<2x8xf32, #tpu.memory_space<vmem>>, %arg12: memref<512x128xf32, #tpu.memory_space<vmem>>, %arg13: memref<1x128xf32, #tpu.memory_space<vmem>>, %arg14: memref<2x128xf32, #tpu.memory_space<vmem>>, %arg15: memref<2x12x128xf32, #tpu.memory_space<vmem>>) attributes {dimension_semantics = [#tpu.dimension_semantics<parallel>], iteration_bounds = array<i64: 1>, scalar_prefetch = 0 : i64, scratch_operands = 1 : i64, tpu.core_type = #tpu.core_type<tc>, window_params = [{transform_indices = @transform_0, window_bounds = array<i64: 2, 20, 128>}, {pipeline_mode = #tpu.pipeline_mode<synchronous>, transform_indices = @transform_1, window_bounds = array<i64: 512, 256>}, {pipeline_mode = #tpu.pipeline_mode<synchronous>, transform_indices = @transform_2, window_bounds = array<i64: 1, 256>}, {pipeline_mode = #tpu.pipeline_mode<synchronous>, transform_indices = @transform_3, window_bounds = array<i64: 256, 256>}, {pipeline_mode = #tpu.pipeline_mode<synchronous>, transform_indices = @transform_4, window_bounds = array<i64: 32, 32>}, {pipeline_mode = #tpu.pipeline_mode<synchronous>, transform_indices = @transform_5, window_bounds = array<i64: 512, 256>}, {pipeline_mode = #tpu.pipeline_mode<synchronous>, transform_indices = @transform_6, window_bounds = array<i64: 1, 256>}, {pipeline_mode = #tpu.pipeline_mode<synchronous>, transform_indices = @transform_7, window_bounds = array<i64: 256, 256>}, {pipeline_mode = #tpu.pipeline_mode<synchronous>, transform_indices = @transform_8, window_bounds = array<i64: 16, 16>}, {pipeline_mode = #tpu.pipeline_mode<synchronous>, transform_indices = @transform_9, window_bounds = array<i64: 8, 512>}, {pipeline_mode = #tpu.pipeline_mode<synchronous>, transform_indices = @transform_10, window_bounds = array<i64: 2, 8>}, {pipeline_mode = #tpu.pipeline_mode<synchronous>, transform_indices = @transform_11, window_bounds = array<i64: 512, 128>}, {pipeline_mode = #tpu.pipeline_mode<synchronous>, transform_indices = @transform_12, window_bounds = array<i64: 1, 128>}, {transform_indices = @transform_13, window_bounds = array<i64: 2, 128>}]} {
    %c0 = arith.constant 0 : index
    %c0_0 = arith.constant 0 : index
    %c0_1 = arith.constant 0 : index
    %0 = vector.load %arg1[%c0, %c0_0, %c0_1] : memref<2x20x128xf32, #tpu.memory_space<vmem>>, vector<2x16x128xf32>
    %1 = vector.shape_cast %0 : vector<2x16x128xf32> to vector<32x128xf32>
    %c0_2 = arith.constant 0 : index
    %c1 = arith.constant 1 : index
    %c0_3 = arith.constant 0 : index
    %2 = vector.load %arg1[%c0_2, %c1, %c0_3] : memref<2x20x128xf32, #tpu.memory_space<vmem>>, vector<2x16x128xf32>
    %3 = vector.shape_cast %2 : vector<2x16x128xf32> to vector<32x128xf32>
    %c0_4 = arith.constant 0 : index
    %c2 = arith.constant 2 : index
    %c0_5 = arith.constant 0 : index
    %4 = vector.load %arg1[%c0_4, %c2, %c0_5] : memref<2x20x128xf32, #tpu.memory_space<vmem>>, vector<2x16x128xf32>
    %5 = vector.shape_cast %4 : vector<2x16x128xf32> to vector<32x128xf32>
    %c0_6 = arith.constant 0 : index
    %c3 = arith.constant 3 : index
    %c0_7 = arith.constant 0 : index
    %6 = vector.load %arg1[%c0_6, %c3, %c0_7] : memref<2x20x128xf32, #tpu.memory_space<vmem>>, vector<2x16x128xf32>
    %7 = vector.shape_cast %6 : vector<2x16x128xf32> to vector<32x128xf32>
    %8 = tpu.concatenate %1, %3, %5, %7 in 1 : vector<32x128xf32>, vector<32x128xf32>, vector<32x128xf32>, vector<32x128xf32> -> vector<32x512xf32>
    %c0_8 = arith.constant 0 : index
    %c0_9 = arith.constant 0 : index
    %9 = vector.load %arg2[%c0_8, %c0_9] : memref<512x256xf32, #tpu.memory_space<vmem>>, vector<512x256xf32>
    %cst = arith.constant dense<0.000000e+00> : vector<32x256xf32>
    %10 = tpu.matmul %8, %9, %cst {dimension_numbers = #tpu.dot_dimension_numbers<[1], [0], [0], [1], [0, 0, 1, 1], [], []>} : vector<32x512xf32>, vector<512x256xf32>, vector<32x256xf32> -> vector<32x256xf32>
    %c0_10 = arith.constant 0 : index
    %c0_11 = arith.constant 0 : index
    %11 = vector.load %arg3[%c0_10, %c0_11] : memref<1x256xf32, #tpu.memory_space<vmem>>, vector<1x256xf32>
    %12 = vector.broadcast %11 : vector<1x256xf32> to vector<32x256xf32>
    %13 = arith.addf %10, %12 : vector<32x256xf32>
    %cst_12 = arith.constant 0.000000e+00 : f32
    %14 = vector.broadcast %cst_12 : f32 to vector<32x256xf32>
    %15 = arith.maximumf %13, %14 : vector<32x256xf32>
    %c0_13 = arith.constant 0 : index
    %c0_14 = arith.constant 0 : index
    %16 = vector.load %arg4[%c0_13, %c0_14] : memref<256x256xf32, #tpu.memory_space<vmem>>, vector<256x256xf32>
    %cst_15 = arith.constant dense<0.000000e+00> : vector<32x256xf32>
    %17 = tpu.matmul %15, %16, %cst_15 {dimension_numbers = #tpu.dot_dimension_numbers<[1], [0], [0], [1], [0, 0, 1, 1], [], []>} : vector<32x256xf32>, vector<256x256xf32>, vector<32x256xf32> -> vector<32x256xf32>
    %18 = vector.extract_strided_slice %17 {offsets = [0, 0], sizes = [32, 128], strides = [1, 1]} : vector<32x256xf32> to vector<32x128xf32>
    %19 = vector.extract_strided_slice %17 {offsets = [0, 128], sizes = [32, 128], strides = [1, 1]} : vector<32x256xf32> to vector<32x128xf32>
    %20 = arith.maximumf %18, %19 : vector<32x128xf32>
    %c0_16 = arith.constant 0 : index
    %c0_17 = arith.constant 0 : index
    %21 = vector.load %arg5[%c0_16, %c0_17] : memref<32x32xf32, #tpu.memory_space<vmem>>, vector<32x32xf32>
    %cst_18 = arith.constant dense<0.000000e+00> : vector<32x128xf32>
    %22 = tpu.matmul %21, %20, %cst_18 {dimension_numbers = #tpu.dot_dimension_numbers<[1], [0], [0], [1], [0, 0, 1, 1], [], []>} : vector<32x32xf32>, vector<32x128xf32>, vector<32x128xf32> -> vector<32x128xf32>
    %23 = vector.extract_strided_slice %22 {offsets = [0, 0], sizes = [16, 128], strides = [1, 1]} : vector<32x128xf32> to vector<16x128xf32>
    %24 = vector.extract_strided_slice %22 {offsets = [16, 0], sizes = [16, 128], strides = [1, 1]} : vector<32x128xf32> to vector<16x128xf32>
    %25 = arith.maximumf %23, %24 : vector<16x128xf32>
    %cst_19 = arith.constant 0.000000e+00 : f32
    %26 = vector.broadcast %cst_19 : f32 to vector<2x2x128xf32>
    %c0_20 = arith.constant 0 : index
    %c0_21 = arith.constant 0 : index
    %c0_22 = arith.constant 0 : index
    %27 = vector.load %arg15[%c0_20, %c0_21, %c0_22] : memref<2x12x128xf32, #tpu.memory_space<vmem>>, vector<2x2x128xf32>
    tpu.vector_store %arg15[%c0_20, %c0_21, %c0_22], %26 {strides = array<i32>} : memref<2x12x128xf32, #tpu.memory_space<vmem>>, vector<2x2x128xf32>,
    %cst_23 = arith.constant 0.000000e+00 : f32
    %28 = vector.broadcast %cst_23 : f32 to vector<2x2x128xf32>
    %c0_24 = arith.constant 0 : index
    %c10 = arith.constant 10 : index
    %c0_25 = arith.constant 0 : index
    %29 = vector.load %arg15[%c0_24, %c10, %c0_25] : memref<2x12x128xf32, #tpu.memory_space<vmem>>, vector<2x2x128xf32>
    tpu.vector_store %arg15[%c0_24, %c10, %c0_25], %28 {strides = array<i32>} : memref<2x12x128xf32, #tpu.memory_space<vmem>>, vector<2x2x128xf32>,
    %30 = vector.shape_cast %25 : vector<16x128xf32> to vector<2x8x128xf32>
    %c0_26 = arith.constant 0 : index
    %c2_27 = arith.constant 2 : index
    %c0_28 = arith.constant 0 : index
    %31 = vector.load %arg15[%c0_26, %c2_27, %c0_28] : memref<2x12x128xf32, #tpu.memory_space<vmem>>, vector<2x8x128xf32>
    tpu.vector_store %arg15[%c0_26, %c2_27, %c0_28], %30 {strides = array<i32>} : memref<2x12x128xf32, #tpu.memory_space<vmem>>, vector<2x8x128xf32>,
    %c0_29 = arith.constant 0 : index
    %c0_30 = arith.constant 0 : index
    %c0_31 = arith.constant 0 : index
    %32 = vector.load %arg15[%c0_29, %c0_30, %c0_31] : memref<2x12x128xf32, #tpu.memory_space<vmem>>, vector<2x8x128xf32>
    %33 = vector.shape_cast %32 : vector<2x8x128xf32> to vector<16x128xf32>
    %c0_32 = arith.constant 0 : index
    %c1_33 = arith.constant 1 : index
    %c0_34 = arith.constant 0 : index
    %34 = vector.load %arg15[%c0_32, %c1_33, %c0_34] : memref<2x12x128xf32, #tpu.memory_space<vmem>>, vector<2x8x128xf32>
    %35 = vector.shape_cast %34 : vector<2x8x128xf32> to vector<16x128xf32>
    %c0_35 = arith.constant 0 : index
    %c2_36 = arith.constant 2 : index
    %c0_37 = arith.constant 0 : index
    %36 = vector.load %arg15[%c0_35, %c2_36, %c0_37] : memref<2x12x128xf32, #tpu.memory_space<vmem>>, vector<2x8x128xf32>
    %37 = vector.shape_cast %36 : vector<2x8x128xf32> to vector<16x128xf32>
    %c0_38 = arith.constant 0 : index
    %c3_39 = arith.constant 3 : index
    %c0_40 = arith.constant 0 : index
    %38 = vector.load %arg15[%c0_38, %c3_39, %c0_40] : memref<2x12x128xf32, #tpu.memory_space<vmem>>, vector<2x8x128xf32>
    %39 = vector.shape_cast %38 : vector<2x8x128xf32> to vector<16x128xf32>
    %40 = tpu.concatenate %33, %35, %37, %39 in 1 : vector<16x128xf32>, vector<16x128xf32>, vector<16x128xf32>, vector<16x128xf32> -> vector<16x512xf32>
    %c0_41 = arith.constant 0 : index
    %c0_42 = arith.constant 0 : index
    %41 = vector.load %arg6[%c0_41, %c0_42] : memref<512x256xf32, #tpu.memory_space<vmem>>, vector<512x256xf32>
    %cst_43 = arith.constant dense<0.000000e+00> : vector<16x256xf32>
    %42 = tpu.matmul %40, %41, %cst_43 {dimension_numbers = #tpu.dot_dimension_numbers<[1], [0], [0], [1], [0, 0, 1, 1], [], []>} : vector<16x512xf32>, vector<512x256xf32>, vector<16x256xf32> -> vector<16x256xf32>
    %c0_44 = arith.constant 0 : index
    %c0_45 = arith.constant 0 : index
    %43 = vector.load %arg7[%c0_44, %c0_45] : memref<1x256xf32, #tpu.memory_space<vmem>>, vector<1x256xf32>
    %44 = vector.broadcast %43 : vector<1x256xf32> to vector<16x256xf32>
    %45 = arith.addf %42, %44 : vector<16x256xf32>
    %cst_46 = arith.constant 0.000000e+00 : f32
    %46 = vector.broadcast %cst_46 : f32 to vector<16x256xf32>
    %47 = arith.maximumf %45, %46 : vector<16x256xf32>
    %c0_47 = arith.constant 0 : index
    %c0_48 = arith.constant 0 : index
    %48 = vector.load %arg8[%c0_47, %c0_48] : memref<256x256xf32, #tpu.memory_space<vmem>>, vector<256x256xf32>
    %cst_49 = arith.constant dense<0.000000e+00> : vector<16x256xf32>
    %49 = tpu.matmul %47, %48, %cst_49 {dimension_numbers = #tpu.dot_dimension_numbers<[1], [0], [0], [1], [0, 0, 1, 1], [], []>} : vector<16x256xf32>, vector<256x256xf32>, vector<16x256xf32> -> vector<16x256xf32>
    %50 = vector.extract_strided_slice %49 {offsets = [0, 0], sizes = [16, 128], strides = [1, 1]} : vector<16x256xf32> to vector<16x128xf32>
    %51 = vector.extract_strided_slice %49 {offsets = [0, 128], sizes = [16, 128], strides = [1, 1]} : vector<16x256xf32> to vector<16x128xf32>
    %52 = arith.maximumf %50, %51 : vector<16x128xf32>
    %c0_50 = arith.constant 0 : index
    %c0_51 = arith.constant 0 : index
    %53 = vector.load %arg9[%c0_50, %c0_51] : memref<16x16xf32, #tpu.memory_space<vmem>>, vector<16x16xf32>
    %cst_52 = arith.constant dense<0.000000e+00> : vector<16x128xf32>
    %54 = tpu.matmul %53, %52, %cst_52 {dimension_numbers = #tpu.dot_dimension_numbers<[1], [0], [0], [1], [0, 0, 1, 1], [], []>} : vector<16x16xf32>, vector<16x128xf32>, vector<16x128xf32> -> vector<16x128xf32>
    %55 = vector.extract_strided_slice %54 {offsets = [0, 0], sizes = [8, 128], strides = [1, 1]} : vector<16x128xf32> to vector<8x128xf32>
    %56 = vector.extract_strided_slice %54 {offsets = [8, 0], sizes = [8, 128], strides = [1, 1]} : vector<16x128xf32> to vector<8x128xf32>
    %57 = arith.maximumf %55, %56 : vector<8x128xf32>
    %58 = tpu.concatenate %57, %57, %57, %57 in 1 : vector<8x128xf32>, vector<8x128xf32>, vector<8x128xf32>, vector<8x128xf32> -> vector<8x512xf32>
    %c0_53 = arith.constant 0 : index
    %c0_54 = arith.constant 0 : index
    %59 = vector.load %arg11[%c0_53, %c0_54] : memref<2x8xf32, #tpu.memory_space<vmem>>, vector<2x8xf32>
    %c0_55 = arith.constant 0 : index
    %c0_56 = arith.constant 0 : index
    %60 = vector.load %arg10[%c0_55, %c0_56] : memref<8x512xf32, #tpu.memory_space<vmem>>, vector<8x512xf32>
    %61 = arith.mulf %58, %60 : vector<8x512xf32>
    %cst_57 = arith.constant dense<0.000000e+00> : vector<2x512xf32>
    %62 = tpu.matmul %59, %61, %cst_57 {dimension_numbers = #tpu.dot_dimension_numbers<[1], [0], [0], [1], [0, 0, 1, 1], [], []>} : vector<2x8xf32>, vector<8x512xf32>, vector<2x512xf32> -> vector<2x512xf32>
    %c0_58 = arith.constant 0 : index
    %c0_59 = arith.constant 0 : index
    %63 = vector.load %arg12[%c0_58, %c0_59] : memref<512x128xf32, #tpu.memory_space<vmem>>, vector<512x128xf32>
    %cst_60 = arith.constant dense<0.000000e+00> : vector<2x128xf32>
    %64 = tpu.matmul %62, %63, %cst_60 {dimension_numbers = #tpu.dot_dimension_numbers<[1], [0], [0], [1], [0, 0, 1, 1], [], []>} : vector<2x512xf32>, vector<512x128xf32>, vector<2x128xf32> -> vector<2x128xf32>
    %c0_61 = arith.constant 0 : index
    %c0_62 = arith.constant 0 : index
    %65 = vector.load %arg13[%c0_61, %c0_62] : memref<1x128xf32, #tpu.memory_space<vmem>>, vector<1x128xf32>
    %66 = vector.broadcast %65 : vector<1x128xf32> to vector<2x128xf32>
    %67 = arith.addf %64, %66 : vector<2x128xf32>
    %c0_63 = arith.constant 0 : index
    %c0_64 = arith.constant 0 : index
    %68 = vector.load %arg14[%c0_63, %c0_64] : memref<2x128xf32, #tpu.memory_space<vmem>>, vector<2x128xf32>
    tpu.vector_store %arg14[%c0_63, %c0_64], %67 {strides = array<i32>} : memref<2x128xf32, #tpu.memory_space<vmem>>, vector<2x128xf32>,
    return
  }
  func.func @transform_0(%arg0: i32) -> (i32, i32, i32) {
    %c0_i32 = arith.constant 0 : i32
    %c0_i32_0 = arith.constant 0 : i32
    %c0_i32_1 = arith.constant 0 : i32
    return %arg0, %c0_i32, %c0_i32_0 : i32, i32, i32
  }
  func.func @transform_1(%arg0: i32) -> (i32, i32) {
    %c0_i32 = arith.constant 0 : i32
    %c0_i32_0 = arith.constant 0 : i32
    %c0_i32_1 = arith.constant 0 : i32
    return %c0_i32, %c0_i32_0 : i32, i32
  }
  func.func @transform_2(%arg0: i32) -> (i32, i32) {
    %c0_i32 = arith.constant 0 : i32
    %c0_i32_0 = arith.constant 0 : i32
    %c0_i32_1 = arith.constant 0 : i32
    return %c0_i32, %c0_i32_0 : i32, i32
  }
  func.func @transform_3(%arg0: i32) -> (i32, i32) {
    %c0_i32 = arith.constant 0 : i32
    %c0_i32_0 = arith.constant 0 : i32
    %c0_i32_1 = arith.constant 0 : i32
    return %c0_i32, %c0_i32_0 : i32, i32
  }
  func.func @transform_4(%arg0: i32) -> (i32, i32) {
    %c0_i32 = arith.constant 0 : i32
    %c0_i32_0 = arith.constant 0 : i32
    %c0_i32_1 = arith.constant 0 : i32
    return %c0_i32, %c0_i32_0 : i32, i32
  }
  func.func @transform_5(%arg0: i32) -> (i32, i32) {
    %c0_i32 = arith.constant 0 : i32
    %c0_i32_0 = arith.constant 0 : i32
    %c0_i32_1 = arith.constant 0 : i32
    return %c0_i32, %c0_i32_0 : i32, i32
  }
  func.func @transform_6(%arg0: i32) -> (i32, i32) {
    %c0_i32 = arith.constant 0 : i32
    %c0_i32_0 = arith.constant 0 : i32
    %c0_i32_1 = arith.constant 0 : i32
    return %c0_i32, %c0_i32_0 : i32, i32
  }
  func.func @transform_7(%arg0: i32) -> (i32, i32) {
    %c0_i32 = arith.constant 0 : i32
    %c0_i32_0 = arith.constant 0 : i32
    %c0_i32_1 = arith.constant 0 : i32
    return %c0_i32, %c0_i32_0 : i32, i32
  }
  func.func @transform_8(%arg0: i32) -> (i32, i32) {
    %c0_i32 = arith.constant 0 : i32
    %c0_i32_0 = arith.constant 0 : i32
    %c0_i32_1 = arith.constant 0 : i32
    return %c0_i32, %c0_i32_0 : i32, i32
  }
  func.func @transform_9(%arg0: i32) -> (i32, i32) {
    %c0_i32 = arith.constant 0 : i32
    %c0_i32_0 = arith.constant 0 : i32
    %c0_i32_1 = arith.constant 0 : i32
    return %c0_i32, %c0_i32_0 : i32, i32
  }
  func.func @transform_10(%arg0: i32) -> (i32, i32) {
    %c0_i32 = arith.constant 0 : i32
    %c0_i32_0 = arith.constant 0 : i32
    %c0_i32_1 = arith.constant 0 : i32
    return %c0_i32, %c0_i32_0 : i32, i32
  }
  func.func @transform_11(%arg0: i32) -> (i32, i32) {
    %c0_i32 = arith.constant 0 : i32
    %c0_i32_0 = arith.constant 0 : i32
    %c0_i32_1 = arith.constant 0 : i32
    return %c0_i32, %c0_i32_0 : i32, i32
  }
  func.func @transform_12(%arg0: i32) -> (i32, i32) {
    %c0_i32 = arith.constant 0 : i32
    %c0_i32_0 = arith.constant 0 : i32
    %c0_i32_1 = arith.constant 0 : i32
    return %c0_i32, %c0_i32_0 : i32, i32
  }
  func.func @transform_13(%arg0: i32) -> (i32, i32) {
    %c0_i32 = arith.constant 0 : i32
    %c0_i32_0 = arith.constant 0 : i32
    return %arg0, %c0_i32 : i32, i32
  }
}

</mosaic_0001>

<bundles_post_ra>
// kernel: cnn_forward.1
= control target key start
LH: loop header
LB: loop body
LE: loop exit
PB: predicated region body
PF: predicated region fallthrough
CT: control target
= control target key end

     0   :  { %18 = vsyncpa [#allocation4], 0  ;;  %s2828_s0 = inlined_call_operand.vmem [shape: f32[2,20,128], index: 0, kind: input, shape index: {}]   ;;  %s2829_s1 = inlined_call_operand.hbm [shape: f32[512,256], index: 1, kind: input, shape index: {}]   ;;  %s2830_s2 = inlined_call_operand.vmem [shape: f32[1,256], index: 2, kind: input, shape index: {}]   ;;  %s2831_s3 = inlined_call_operand.vmem [shape: f32[256,256], index: 3, kind: input, shape index: {}]   ;;  %s2832_s4 = inlined_call_operand.vmem [shape: f32[32,32], index: 4, kind: input, shape index: {}]   ;;  %s2833_s5 = inlined_call_operand.hbm [shape: f32[512,256], index: 5, kind: input, shape index: {}]   ;;  %s2834_s6 = inlined_call_operand.vmem [shape: f32[1,256], index: 6, kind: input, shape index: {}]   ;;  %s2835_s7 = inlined_call_operand.hbm [shape: f32[256,256], index: 7, kind: input, shape index: {}]   ;;  %s2836_s8 = inlined_call_operand.vmem [shape: f32[16,16], index: 8, kind: input, shape index: {}]   ;;  %s2837_s9 = inlined_call_operand.vmem [shape: f32[8,512], index: 9, kind: input, shape index: {}]   ;;  %s2838_s10 = inlined_call_operand.vmem [shape: f32[2,8], index: 10, kind: input, shape index: {}]   ;;  %s2839_s11 = inlined_call_operand.hbm [shape: f32[512,128], index: 11, kind: input, shape index: {}]   ;;  %s2840_s12 = inlined_call_operand.vmem [shape: f32[1,128], index: 12, kind: input, shape index: {}]   ;;  %s2841_s13 = inlined_call_operand.hbm [shape: f32[2,128], index: 13, kind: output, shape index: {}]  }
   0x1   :  { %19 = vsyncpa [#allocation7], 0 }
   0x2   :  { %20 = vsyncpa [#allocation10], 0 }
   0x3   :  { %21 = vsyncpa [#allocation5], 0  ;;  %s2351_s25 = smov [#allocation6]   ;;  %s2352_s27 = smov [#allocation3]  }
   0x4   :  { %s47_s26 = sshll.u32 %s2351_s25, 4  ;;  %s29_s28 = sshll.u32 %s2352_s27, 4  ;;  %s48_s26 = int_to_ptr.vmem [resolvable:$true] %s47_s26  ;;  %s2431_s28 = int_to_ptr.vmem [resolvable:$true] %s29_s28 }
   0x5   :  { %s2233_s14 = scalar_lea.hbm %s2833_s5, 16384 }
   0x6   :  { %p2234_p0 = scmp.ne.s32.totalorder %s2833_s5, %s2233_s14  ;;  %p2237_p1 = scmp.lt.u32.totalorder %s2233_s14, %s2833_s5 }
   0x8   :  { %p2239_p2 = pnand %p2237_p1, %p2234_p0 }
   0xa   :  { %2242 = shalt.err (!%p2239_p2)
}
   0xb   :  { %s2243_s19 = scalar_lea.vmem %s48_s26, 16384  ;;  %p2248_p4 = scmp.lt.s32.totalorder %s48_s26, %s48_s26 }
   0xc   :  { %p2244_p3 = scmp.ne.s32.totalorder %s48_s26, %s2243_s19  ;;  %p2249_p5 = scmp.lt.s32.totalorder %s2243_s19, %s2243_s19 }
   0xe   :  { %p2250_p6 = por %p2249_p5, %p2248_p4 }
  0x10   :  { %p2251_p7 = pnand %p2250_p6, %p2244_p3 }
  0x12   :  { %2254 = shalt.err (!%p2251_p7)
}
  0x13   :  { %s2353_s20 = smov 256   ;;  %s2354_s21 = smov 16  }
  0x14   :  { %53 = dma.hbm_to_vmem [thread:$0]  %s2833_s5, 16384, %s48_s26, [#allocation7], %s2353_s20, %s2353_s20, %s2354_s21  }
  0x15   :  { %s2255_s27 = scalar_lea.hbm %s2829_s1, 16384 }
  0x16   :  { %p2256_p8 = scmp.ne.s32.totalorder %s2829_s1, %s2255_s27  ;;  %p2259_p9 = scmp.lt.u32.totalorder %s2255_s27, %s2829_s1 }
  0x18   :  { %p2261_p10 = pnand %p2259_p9, %p2256_p8 }
  0x1a   :  { %2264 = shalt.err (!%p2261_p10)
}
  0x1b   :  { %s2265_s16 = scalar_lea.vmem %s2431_s28, 16384  ;;  %p2270_p12 = scmp.lt.s32.totalorder %s2431_s28, %s2431_s28 }
  0x1c   :  { %p2266_p11 = scmp.ne.s32.totalorder %s2431_s28, %s2265_s16  ;;  %p2271_p13 = scmp.lt.s32.totalorder %s2265_s16, %s2265_s16 }
  0x1e   :  { %p2272_p0 = por %p2271_p13, %p2270_p12 }
  0x20   :  { %p2273_p1 = pnand %p2272_p0, %p2266_p11 }
  0x22   :  { %2276 = shalt.err (!%p2273_p1)
}
  0x23   :  { %35 = dma.hbm_to_vmem [thread:$0]  %s2829_s1, 16384, %s2431_s28, [#allocation4], %s2353_s20, %s2353_s20, %s2354_s21  }
  0x24   :  { %s2355_s17 = smov [#allocation8]   ;;  %s2356_s19 = smov [#allocation9]  }
  0x25   :  { %s61_s18 = sshll.u32 %s2355_s17, 4  ;;  %s79_s22 = sshll.u32 %s2356_s19, 4  ;;  %s62_s18 = int_to_ptr.vmem [resolvable:$true] %s61_s18  ;;  %s2468_s22 = int_to_ptr.vmem [resolvable:$true] %s79_s22 }
  0x26   :  { %s2277_s25 = scalar_lea.hbm %s2835_s7, 8192 }
  0x27   :  { %p2278_p2 = scmp.ne.s32.totalorder %s2835_s7, %s2277_s25  ;;  %p2281_p3 = scmp.lt.u32.totalorder %s2277_s25, %s2835_s7 }
  0x29   :  { %p2283_p4 = pnand %p2281_p3, %p2278_p2 }
  0x2b   :  { %2286 = shalt.err (!%p2283_p4)
}
  0x2c   :  { %s2287_s1 = scalar_lea.vmem %s62_s18, 8192  ;;  %p2292_p6 = scmp.lt.s32.totalorder %s62_s18, %s62_s18 }
  0x2d   :  { %p2288_p5 = scmp.ne.s32.totalorder %s62_s18, %s2287_s1  ;;  %p2293_p7 = scmp.lt.s32.totalorder %s2287_s1, %s2287_s1 }
  0x2f   :  { %p2294_p8 = por %p2293_p7, %p2292_p6 }
  0x31   :  { %p2295_p9 = pnand %p2294_p8, %p2288_p5 }
  0x33   :  { %2298 = shalt.err (!%p2295_p9)
}
  0x34   :  { %67 = dma.hbm_to_vmem [thread:$0]  %s2835_s7, 8192, %s62_s18, [#allocation7], %s2353_s20, %s2353_s20, %s2354_s21  }
  0x35   :  { %s2299_s26 = scalar_lea.hbm %s2839_s11, 8192 }
  0x36   :  { %p2300_p10 = scmp.ne.s32.totalorder %s2839_s11, %s2299_s26  ;;  %p2303_p11 = scmp.lt.u32.totalorder %s2299_s26, %s2839_s11 }
  0x38   :  { %p2305_p12 = pnand %p2303_p11, %p2300_p10 }
  0x3a   :  { %2308 = shalt.err (!%p2305_p12)
}
  0x3b   :  { %s2309_s25 = scalar_lea.vmem %s2468_s22, 8192  ;;  %p2314_p0 = scmp.lt.s32.totalorder %s2468_s22, %s2468_s22 }
  0x3c   :  { %p2310_p13 = scmp.ne.s32.totalorder %s2468_s22, %s2309_s25  ;;  %p2315_p1 = scmp.lt.s32.totalorder %s2309_s25, %s2309_s25 }
  0x3e   :  { %p2316_p2 = por %p2315_p1, %p2314_p0 }
  0x40   :  { %p2317_p3 = pnand %p2316_p2, %p2310_p13 }
  0x42   :  { %2320 = shalt.err (!%p2317_p3)
}
  0x43   :  { %s2357_s7 = smov 128   ;;  %s2358_s20 = smov 8  }
  0x44   :  { %85 = dma.hbm_to_vmem [thread:$0]  %s2839_s11, 8192, %s2468_s22, [#allocation10], %s2357_s7, %s2357_s7, %s2358_s20  }
  0x45   :  { %2343 = dma.done.wait [#allocation4], 16384  }
  0x46   :  { %2344 = vsyncadd [#allocation4], 4294950912 }
  0x47   :  { %2345 = dma.done.wait [#allocation7], 24576  }
  0x48   :  { %2346 = vsyncadd [#allocation7], 4294942720 }
  0x49   :  { %2347 = dma.done.wait [#allocation10], 8192  }
  0x4a   :  { %2348 = vsyncadd [#allocation10], 4294959104  ;;  %v117_v0 = vld [vmem:[#allocation3 + $0x8] sm:$0xff]  ;;  %v119_v1 = vld [vmem:[#allocation3 + $0x18] sm:$0xff]  ;;  %vm603_vm0 = vcmask 261120   ;;  %vm1160_vm1 = vcmask 130048  }
  0x4b   :  { %v116_v2 = vld [vmem:[#allocation3] sm:$0xff]  ;;  %v1739_v3 = vpack.c.bf16 %v119_v1, %v117_v0  ;;  %v118_v4 = vld [vmem:[#allocation3 + $0x10] sm:$0xff]  ;;  %v121_v5 = vld [vmem:[#allocation3 + $0x28] sm:$0xff]  ;;  %vm1252_vm2 = vcmask 64512   ;;  %s2360_s26 = smov [#allocation11]  }
  0x4c   :  { %v123_v6 = vld [vmem:[#allocation3 + $0x38] sm:$0xff]  ;;  %v1741_v7 = vpack.c.bf16 %v118_v4, %v116_v2  ;;  %v120_v9 = vld [vmem:[#allocation3 + $0x20] sm:$0xff]  ;;  %v122_v10 = vld [vmem:[#allocation3 + $0x30] sm:$0xff]  ;;  %s1616_s17 = sshll.u32 %s2360_s26, 4  ;;  %s1617_s17 = int_to_ptr.vmem [resolvable:$true] %s1616_s17 }
  0x4d   :  { %v1743_v8 = vpack.c.bf16 %v123_v6, %v121_v5  ;;  %v125_v11 = vld [vmem:[#allocation3 + $0x48] sm:$0xff]  ;;  %1740 = vmatprep.subr.bf16.mxu0 %v1739_v3  ;;  %v127_v12 = vld [vmem:[#allocation3 + $0x58] sm:$0xff]  ;;  %v1745_v13 = vpack.c.bf16 %v122_v10, %v120_v9  ;;  %v124_v15 = vld [vmem:[#allocation3 + $0x40] sm:$0xff]  ;;  %s2321_s19 = scalar_lea.vmem %s1617_s17, 32  ;;  %p2326_p5 = scmp.lt.s32.totalorder %s1617_s17, %s1617_s17 }
  0x4e   :  { %1742 = vmatpush1.bf16.msra.mxu0 %v1741_v7  ;;  %v1747_v14 = vpack.c.bf16 %v127_v12, %v125_v11  ;;  %v126_v16 = vld [vmem:[#allocation3 + $0x50] sm:$0xff]  ;;  %v129_v17 = vld [vmem:[#allocation3 + $0x68] sm:$0xff]  ;;  %v131_v18 = vld [vmem:[#allocation3 + $0x78] sm:$0xff]  ;;  %p2322_p4 = scmp.ne.s32.totalorder %s1617_s17, %s2321_s19  ;;  %p2327_p6 = scmp.lt.s32.totalorder %s2321_s19, %s2321_s19 }
  0x4f   :  { %1744 = vmatprep.subr.bf16.mxu0 %v1743_v8  ;;  %v1749_v19 = vpack.c.bf16 %v126_v16, %v124_v15  ;;  %v1751_v20 = vpack.c.bf16 %v131_v18, %v129_v17  ;;  %v128_v21 = vld [vmem:[#allocation3 + $0x60] sm:$0xff]  ;;  %v130_v22 = vld [vmem:[#allocation3 + $0x70] sm:$0xff]  ;;  %v133_v23 = vld [vmem:[#allocation3 + $0x88] sm:$0xff] }
  0x50   :  { %v135_v24 = vld [vmem:[#allocation3 + $0x98] sm:$0xff]  ;;  %v1753_v25 = vpack.c.bf16 %v130_v22, %v128_v21  ;;  %v132_v27 = vld [vmem:[#allocation3 + $0x80] sm:$0xff]  ;;  %v134_v28 = vld [vmem:[#allocation3 + $0x90] sm:$0xff]  ;;  %p2328_p7 = por %p2327_p6, %p2326_p5 }
  0x51   :  { %v1755_v26 = vpack.c.bf16 %v135_v24, %v133_v23  ;;  %v137_v29 = vld [vmem:[#allocation3 + $0xa8] sm:$0xff]  ;;  %v139_v30 = vld [vmem:[#allocation3 + $0xb8] sm:$0xff]  ;;  %v1757_v31 = vpack.c.bf16 %v134_v28, %v132_v27  ;;  %v136_v33 = vld [vmem:[#allocation3 + $0xa0] sm:$0xff] }
  0x52   :  { %1746 = vmatpush1.bf16.msra.mxu0 %v1745_v13  ;;  %v1759_v32 = vpack.c.bf16 %v139_v30, %v137_v29  ;;  %v138_v34 = vld [vmem:[#allocation3 + $0xb0] sm:$0xff]  ;;  %v141_v35 = vld [vmem:[#allocation3 + $0xc8] sm:$0xff]  ;;  %v143_v36 = vld [vmem:[#allocation3 + $0xd8] sm:$0xff]  ;;  %p2329_p8 = pnand %p2328_p7, %p2322_p4 }
  0x53   :  { %1748 = vmatprep.subr.bf16.mxu0 %v1747_v14  ;;  %v1761_v37 = vpack.c.bf16 %v138_v34, %v136_v33  ;;  %v1763_v38 = vpack.c.bf16 %v143_v36, %v141_v35  ;;  %v140_v39 = vld [vmem:[#allocation3 + $0xc0] sm:$0xff]  ;;  %v142_v40 = vld [vmem:[#allocation3 + $0xd0] sm:$0xff]  ;;  %v145_v42 = vld [vmem:[#allocation3 + $0xe8] sm:$0xff] }
  0x54   :  { %v104_v41 = vld [vmem:[%s2828_s0 + $0x1] sm:$0xff]  ;;  %v147_v43 = vld [vmem:[#allocation3 + $0xf8] sm:$0xff]  ;;  %v1765_v44 = vpack.c.bf16 %v142_v40, %v140_v39  ;;  %v146_v47 = vld [vmem:[#allocation3 + $0xf0] sm:$0xff] }
  0x55   :  { %320 = vmatprep.mubr.f32.mxu0 %v104_v41  ;;  %v1767_v45 = vpack.c.bf16 %v147_v43, %v145_v42  ;;  %v144_v46 = vld [vmem:[#allocation3 + $0xe0] sm:$0xff]  ;;  %v149_v48 = vld [vmem:[#allocation3 + $0x108] sm:$0xff]  ;;  %v151_v49 = vld [vmem:[#allocation3 + $0x118] sm:$0xff] }
  0x56   :  { %1750 = vmatpush1.bf16.msra.mxu0 %v1749_v19  ;;  %v1769_v50 = vpack.c.bf16 %v146_v47, %v144_v46  ;;  %v1771_v51 = vpack.c.bf16 %v151_v49, %v149_v48  ;;  %v148_v52 = vld [vmem:[#allocation3 + $0x100] sm:$0xff]  ;;  %v150_v53 = vld [vmem:[#allocation3 + $0x110] sm:$0xff]  ;;  %v153_v54 = vld [vmem:[#allocation3 + $0x128] sm:$0xff] }
  0x57   :  { %1752 = vmatprep.subr.bf16.mxu0 %v1751_v20  ;;  %v155_v55 = vld [vmem:[#allocation3 + $0x138] sm:$0xff]  ;;  %v1773_v56 = vpack.c.bf16 %v150_v53, %v148_v52  ;;  %v152_v58 = vld [vmem:[#allocation3 + $0x120] sm:$0xff]  ;;  %v154_v59 = vld [vmem:[#allocation3 + $0x130] sm:$0xff] }
  0x58   :  { %v1775_v57 = vpack.c.bf16 %v155_v55, %v153_v54  ;;  %v157_v60 = vld [vmem:[#allocation3 + $0x148] sm:$0xff]  ;;  %v159_v61 = vld [vmem:[#allocation3 + $0x158] sm:$0xff]  ;;  %v1777_v62 = vpack.c.bf16 %v154_v59, %v152_v58  ;;  %v156_v0 = vld [vmem:[#allocation3 + $0x140] sm:$0xff] }
  0x59   :  { %v1779_v63 = vpack.c.bf16 %v159_v61, %v157_v60  ;;  %v158_v1 = vld [vmem:[#allocation3 + $0x150] sm:$0xff]  ;;  %v161_v2 = vld [vmem:[#allocation3 + $0x168] sm:$0xff]  ;;  %v163_v3 = vld [vmem:[#allocation3 + $0x178] sm:$0xff] }
  0x5a   :  { %1754 = vmatpush1.bf16.msra.mxu0 %v1753_v25  ;;  %v1781_v4 = vpack.c.bf16 %v158_v1, %v156_v0  ;;  %v1783_v5 = vpack.c.bf16 %v163_v3, %v161_v2  ;;  %v160_v6 = vld [vmem:[#allocation3 + $0x160] sm:$0xff]  ;;  %v162_v7 = vld [vmem:[#allocation3 + $0x170] sm:$0xff]  ;;  %v165_v8 = vld [vmem:[#allocation3 + $0x188] sm:$0xff] }
  0x5b   :  { %1756 = vmatprep.subr.bf16.mxu0 %v1755_v26  ;;  %v167_v9 = vld [vmem:[#allocation3 + $0x198] sm:$0xff]  ;;  %v1785_v10 = vpack.c.bf16 %v162_v7, %v160_v6  ;;  %v164_v12 = vld [vmem:[#allocation3 + $0x180] sm:$0xff]  ;;  %v166_v13 = vld [vmem:[#allocation3 + $0x190] sm:$0xff] }
  0x5c   :  { %v1787_v11 = vpack.c.bf16 %v167_v9, %v165_v8  ;;  %v169_v14 = vld [vmem:[#allocation3 + $0x1a8] sm:$0xff]  ;;  %v171_v15 = vld [vmem:[#allocation3 + $0x1b8] sm:$0xff]  ;;  %v168_v16 = vld [vmem:[#allocation3 + $0x1a0] sm:$0xff]  ;;  %v1789_v18 = vpack.c.bf16 %v166_v13, %v164_v12 }
  0x5d   :  { %v170_v17 = vld [vmem:[#allocation3 + $0x1b0] sm:$0xff]  ;;  %v173_v19 = vld [vmem:[#allocation3 + $0x1c8] sm:$0xff]  ;;  %v175_v20 = vld [vmem:[#allocation3 + $0x1d8] sm:$0xff]  ;;  %v1791_v24 = vpack.c.bf16 %v171_v15, %v169_v14 }
  0x5e   :  { %1758 = vmatpush1.bf16.msra.mxu0 %v1757_v31  ;;  %v443_v21 = vld [vmem:[%s2831_s3 + $0x8] sm:$0xff]  ;;  %v445_v22 = vld [vmem:[%s2831_s3 + $0x18] sm:$0xff]  ;;  %v442_v23 = vld [vmem:[%s2831_s3] sm:$0xff]  ;;  %v1793_v35 = vpack.c.bf16 %v170_v17, %v168_v16  ;;  %v1795_v39 = vpack.c.bf16 %v175_v20, %v173_v19 }
  0x5f   :  { %1760 = vmatprep.subr.bf16.mxu0 %v1759_v32  ;;  %v1867_v25 = vpack.c.bf16 %v445_v22, %v443_v21  ;;  %v444_v26 = vld [vmem:[%s2831_s3 + $0x10] sm:$0xff]  ;;  %v447_v27 = vld [vmem:[%s2831_s3 + $0x28] sm:$0xff]  ;;  %v449_v28 = vld [vmem:[%s2831_s3 + $0x38] sm:$0xff] }
  0x60   :  { %v1869_v29 = vpack.c.bf16 %v444_v26, %v442_v23  ;;  %v1871_v30 = vpack.c.bf16 %v449_v28, %v447_v27  ;;  %v446_v31 = vld [vmem:[%s2831_s3 + $0x20] sm:$0xff]  ;;  %v448_v32 = vld [vmem:[%s2831_s3 + $0x30] sm:$0xff]  ;;  %v451_v33 = vld [vmem:[%s2831_s3 + $0x48] sm:$0xff] }
  0x61   :  { %1868 = vmatprep.subr.bf16.mxu1 %v1867_v25  ;;  %v453_v34 = vld [vmem:[%s2831_s3 + $0x58] sm:$0xff]  ;;  %v172_v36 = vld [vmem:[#allocation3 + $0x1c0] sm:$0xff]  ;;  %v177_v40 = vld [vmem:[#allocation3 + $0x1e8] sm:$0xff] }
  0x62   :  { %1762 = vmatpush1.bf16.msra.mxu0 %v1761_v37  ;;  %v174_v37 = vld [vmem:[#allocation3 + $0x1d0] sm:$0xff]  ;;  %1870 = vmatpush1.bf16.msra.mxu1 %v1869_v29  ;;  %v1875_v41 = vpack.c.bf16 %v453_v34, %v451_v33  ;;  %v450_v42 = vld [vmem:[%s2831_s3 + $0x40] sm:$0xff]  ;;  %v457_v46 = vld [vmem:[%s2831_s3 + $0x78] sm:$0xff] }
  0x63   :  { %1764 = vmatprep.subr.bf16.mxu0 %v1763_v38  ;;  %v1873_v38 = vpack.c.bf16 %v448_v32, %v446_v31  ;;  %1872 = vmatprep.subr.bf16.mxu1 %v1871_v30  ;;  %v452_v43 = vld [vmem:[%s2831_s3 + $0x50] sm:$0xff]  ;;  %v1797_v47 = vpack.c.bf16 %v174_v37, %v172_v36  ;;  %v176_v48 = vld [vmem:[#allocation3 + $0x1e0] sm:$0xff]  ;;  %v181_v52 = vld [vmem:[#allocation3 + $0x208] sm:$0xff] }
  0x64   :  { %v178_v49 = vld [vmem:[#allocation3 + $0x1f0] sm:$0xff]  ;;  %v454_v54 = vld [vmem:[%s2831_s3 + $0x60] sm:$0xff]  ;;  %v461_v58 = vld [vmem:[%s2831_s3 + $0x98] sm:$0xff] }
  0x65   :  { %v456_v55 = vld [vmem:[%s2831_s3 + $0x70] sm:$0xff]  ;;  %v1801_v59 = vpack.c.bf16 %v178_v49, %v176_v48  ;;  %v185_v0 = vld [vmem:[#allocation3 + $0x228] sm:$0xff]  ;;  %v187_v2 = vld [vmem:[#allocation3 + $0x238] sm:$0xff] }
  0x66   :  { %1766 = vmatpush1.bf16.msra.mxu0 %v1765_v44  ;;  %v179_v44 = vld [vmem:[#allocation3 + $0x1f8] sm:$0xff]  ;;  %1874 = vmatpush1.bf16.msra.mxu1 %v1873_v38  ;;  %v1881_v60 = vpack.c.bf16 %v456_v55, %v454_v54  ;;  %v458_v3 = vld [vmem:[%s2831_s3 + $0x80] sm:$0xff]  ;;  %v189_v12 = vld [vmem:[#allocation3 + $0x248] sm:$0xff] }
  0x67   :  { %1768 = vmatprep.subr.bf16.mxu0 %v1767_v45  ;;  %v455_v45 = vld [vmem:[%s2831_s3 + $0x68] sm:$0xff]  ;;  %1876 = vmatprep.subr.bf16.mxu1 %v1875_v41  ;;  %v465_v6 = vld [vmem:[%s2831_s3 + $0xb8] sm:$0xff]  ;;  %v100_v7 = vld [vmem:[%s2828_s0] sm:$0xff] }
  0x68   :  { %v1879_v53 = vpack.c.bf16 %v457_v46, %v455_v45  ;;  %v184_v9 = vld [vmem:[#allocation3 + $0x220] sm:$0xff]  ;;  %v105_v13 = vld [vmem:[%s2828_s0 + $0x9] sm:$0xff]  ;;  %v191_v15 = vld [vmem:[#allocation3 + $0x258] sm:$0xff] }
  0x69   :  { %v462_v17 = vld [vmem:[%s2831_s3 + $0xa0] sm:$0xff]  ;;  %v467_v19 = vld [vmem:[%s2831_s3 + $0xc8] sm:$0xff]  ;;  %v469_v20 = vld [vmem:[%s2831_s3 + $0xd8] sm:$0xff] }
  0x6a   :  { %1770 = vmatpush1.bf16.msra.mxu0 %v1769_v50  ;;  %v1877_v50 = vpack.c.bf16 %v452_v43, %v450_v42  ;;  %v188_v22 = vld [vmem:[#allocation3 + $0x240] sm:$0xff]  ;;  %v101_v23 = vld [vmem:[%s2828_s0 + $0x8] sm:$0xff]  ;;  %v190_v25 = vld [vmem:[#allocation3 + $0x250] sm:$0xff]  ;;  %v1891_v30 = vpack.c.bf16 %v469_v20, %v467_v19 }
  0x6b   :  { %1772 = vmatprep.subr.bf16.mxu0 %v1771_v51  ;;  %v1799_v51 = vpack.c.bf16 %v179_v44, %v177_v40  ;;  %v193_v26 = vld [vmem:[#allocation3 + $0x268] sm:$0xff]  ;;  %v106_v27 = vld [vmem:[%s2828_s0 + $0x19] sm:$0xff]  ;;  %v468_v32 = vld [vmem:[%s2831_s3 + $0xd0] sm:$0xff] }
  0x6c   :  { %1878 = vmatpush1.bf16.msra.mxu1 %v1877_v50  ;;  %v195_v29 = vld [vmem:[#allocation3 + $0x278] sm:$0xff]  ;;  %v466_v31 = vld [vmem:[%s2831_s3 + $0xc0] sm:$0xff]  ;;  %v471_v33 = vld [vmem:[%s2831_s3 + $0xe8] sm:$0xff] }
  0x6d   :  { %1880 = vmatprep.subr.bf16.mxu1 %v1879_v53  ;;  %v473_v34 = vld [vmem:[%s2831_s3 + $0xf8] sm:$0xff]  ;;  %v192_v36 = vld [vmem:[#allocation3 + $0x260] sm:$0xff]  ;;  %v1815_v38 = vpack.c.bf16 %v195_v29, %v193_v26  ;;  %v197_v40 = vld [vmem:[#allocation3 + $0x288] sm:$0xff]  ;;  %v1893_v42 = vpack.c.bf16 %v468_v32, %v466_v31 }
  0x6e   :  { %1774 = vmatpush1.bf16.msra.mxu0 %v1773_v56  ;;  %v183_v56 = vld [vmem:[#allocation3 + $0x218] sm:$0xff]  ;;  %v107_v41 = vld [vmem:[%s2828_s0 + $0x21] sm:$0xff]  ;;  %v1895_v44 = vpack.c.bf16 %v473_v34, %v471_v33  ;;  %v472_v46 = vld [vmem:[%s2831_s3 + $0xf0] sm:$0xff] }
  0x6f   :  { %1776 = vmatprep.subr.bf16.mxu0 %v1775_v57  ;;  %v459_v57 = vld [vmem:[%s2831_s3 + $0x88] sm:$0xff]  ;;  %v1803_v61 = vpack.c.bf16 %v183_v56, %v181_v52  ;;  %v102_v37 = vld [vmem:[%s2828_s0 + $0x18] sm:$0xff]  ;;  %v470_v45 = vld [vmem:[%s2831_s3 + $0xe0] sm:$0xff] }
  0x70   :  { %v1883_v1 = vpack.c.bf16 %v461_v58, %v459_v57  ;;  %1882 = vmatpush1.bf16.msra.mxu1 %v1881_v60  ;;  %v199_v43 = vld [vmem:[#allocation3 + $0x298] sm:$0xff]  ;;  %v196_v50 = vld [vmem:[#allocation3 + $0x280] sm:$0xff]  ;;  %v198_v53 = vld [vmem:[#allocation3 + $0x290] sm:$0xff]  ;;  %v1897_v56 = vpack.c.bf16 %v472_v46, %v470_v45 }
  0x71   :  { %v477_v48 = vld [vmem:[%s2831_s3 + $0x118] sm:$0xff]  ;;  %v1819_v52 = vpack.c.bf16 %v199_v43, %v197_v40  ;;  %v201_v54 = vld [vmem:[#allocation3 + $0x2a8] sm:$0xff]  ;;  %v476_v60 = vld [vmem:[%s2831_s3 + $0x110] sm:$0xff] }
  0x72   :  { %1778 = vmatpush1.bf16.msra.mxu0 %v1777_v62  ;;  %v180_v62 = vld [vmem:[#allocation3 + $0x200] sm:$0xff]  ;;  %1884 = vmatprep.subr.bf16.mxu1 %v1883_v1  ;;  %v203_v57 = vld [vmem:[#allocation3 + $0x2b8] sm:$0xff]  ;;  %v484_v20 = vld [vmem:[%s2831_s3 + $0x150] sm:$0xff] }
  0x73   :  { %1780 = vmatprep.subr.bf16.mxu0 %v1779_v63  ;;  %v182_v63 = vld [vmem:[#allocation3 + $0x210] sm:$0xff]  ;;  %v112_v55 = vld [vmem:[%s2828_s0 + $0x3] sm:$0xff]  ;;  %v215_v29 = vld [vmem:[#allocation3 + $0x318] sm:$0xff] }
  0x74   :  { %v1805_v8 = vpack.c.bf16 %v182_v63, %v180_v62  ;;  %v481_v62 = vld [vmem:[%s2831_s3 + $0x138] sm:$0xff]  ;;  %v1821_v63 = vpack.c.bf16 %v198_v53, %v196_v50  ;;  %v200_v1 = vld [vmem:[#allocation3 + $0x2a0] sm:$0xff]  ;;  %v210_v26 = vld [vmem:[#allocation3 + $0x2f0] sm:$0xff] }
  0x75   :  { %v482_v19 = vld [vmem:[%s2831_s3 + $0x140] sm:$0xff]  ;;  %v488_v32 = vld [vmem:[%s2831_s3 + $0x170] sm:$0xff]  ;;  %v491_v33 = vld [vmem:[%s2831_s3 + $0x188] sm:$0xff] }
  0x76   :  { %1782 = vmatpush1.bf16.msra.mxu0 %v1781_v4  ;;  %v460_v4 = vld [vmem:[%s2831_s3 + $0x90] sm:$0xff]  ;;  %v486_v31 = vld [vmem:[%s2831_s3 + $0x160] sm:$0xff]  ;;  %v493_v34 = vld [vmem:[%s2831_s3 + $0x198] sm:$0xff] }
  0x77   :  { %1784 = vmatprep.subr.bf16.mxu0 %v1783_v5  ;;  %v463_v5 = vld [vmem:[%s2831_s3 + $0xa8] sm:$0xff]  ;;  %v1885_v14 = vpack.c.bf16 %v460_v4, %v458_v3  ;;  %v1913_v40 = vpack.c.bf16 %v488_v32, %v486_v31  ;;  %v490_v43 = vld [vmem:[%s2831_s3 + $0x180] sm:$0xff]  ;;  %v497_v46 = vld [vmem:[%s2831_s3 + $0x1b8] sm:$0xff] }
  0x78   :  { %v1887_v16 = vpack.c.bf16 %v465_v6, %v463_v5  ;;  %v205_v3 = vld [vmem:[#allocation3 + $0x2c8] sm:$0xff]  ;;  %v207_v5 = vld [vmem:[#allocation3 + $0x2d8] sm:$0xff]  ;;  %v218_v50 = vld [vmem:[#allocation3 + $0x330] sm:$0xff] }
  0x79   :  { %1886 = vmatpush1.bf16.msra.mxu1 %v1885_v14  ;;  %v206_v14 = vld [vmem:[#allocation3 + $0x2d0] sm:$0xff]  ;;  %v495_v45 = vld [vmem:[%s2831_s3 + $0x1a8] sm:$0xff]  ;;  %v223_v53 = vld [vmem:[#allocation3 + $0x358] sm:$0xff] }
  0x7a   :  { %1786 = vmatpush1.bf16.msra.mxu0 %v1785_v10  ;;  %v1807_v10 = vpack.c.bf16 %v187_v2, %v185_v0  ;;  %1888 = vmatprep.subr.bf16.mxu1 %v1887_v16  ;;  %v1823_v0 = vpack.c.bf16 %v203_v57, %v201_v54  ;;  %v202_v2 = vld [vmem:[#allocation3 + $0x2b0] sm:$0xff]  ;;  %v1919_v54 = vpack.c.bf16 %v497_v46, %v495_v45  ;;  %v499_v57 = vld [vmem:[%s2831_s3 + $0x1c8] sm:$0xff]  ;;  %v502_v45 = vld [vmem:[%s2831_s3 + $0x1e0] sm:$0xff] }
  0x7b   :  { %1788 = vmatprep.subr.bf16.mxu0 %v1787_v11  ;;  %v186_v11 = vld [vmem:[#allocation3 + $0x230] sm:$0xff]  ;;  %v108_v32 = vld [vmem:[%s2828_s0 + $0x2] sm:$0xff] }
  0x7c   :  { %v1809_v21 = vpack.c.bf16 %v186_v11, %v184_v9  ;;  %v483_v9 = vld [vmem:[%s2831_s3 + $0x148] sm:$0xff]  ;;  %v1825_v11 = vpack.c.bf16 %v202_v2, %v200_v1  ;;  %v227_v1 = vld [vmem:[#allocation3 + $0x378] sm:$0xff]  ;;  %v504_v46 = vld [vmem:[%s2831_s3 + $0x1f0] sm:$0xff] }
  0x7e   :  { %1790 = vmatpush1.bf16.msra.mxu0 %v1789_v18  ;;  %v464_v18 = vld [vmem:[%s2831_s3 + $0xb0] sm:$0xff] }
  0x7f   :  { %1792 = vmatprep.subr.bf16.mxu0 %v1791_v24  ;;  %v1811_v24 = vpack.c.bf16 %v191_v15, %v189_v12  ;;  %v1889_v28 = vpack.c.bf16 %v464_v18, %v462_v17  ;;  %v1827_v12 = vpack.c.bf16 %v207_v5, %v205_v3  ;;  %v209_v15 = vld [vmem:[#allocation3 + $0x2e8] sm:$0xff]  ;;  %v211_v17 = vld [vmem:[#allocation3 + $0x2f8] sm:$0xff]  ;;  %v224_v5 = vld [vmem:[#allocation3 + $0x360] sm:$0xff] }
  0x81   :  { %1890 = vmatpush1.bf16.msra.mxu1 %v1889_v28  ;;  %v1909_v28 = vpack.c.bf16 %v484_v20, %v482_v19  ;;  %v237_v19 = vld [vmem:[#allocation3 + $0x3c8] sm:$0xff]  ;;  %v239_v20 = vld [vmem:[#allocation3 + $0x3d8] sm:$0xff] }
  0x82   :  { %1794 = vmatpush1.bf16.msra.mxu0 %v1793_v35  ;;  %v1813_v35 = vpack.c.bf16 %v190_v25, %v188_v22  ;;  %1892 = vmatprep.subr.bf16.mxu1 %v1891_v30  ;;  %v489_v22 = vld [vmem:[%s2831_s3 + $0x178] sm:$0xff]  ;;  %v208_v25 = vld [vmem:[#allocation3 + $0x2e0] sm:$0xff] }
  0x83   :  { %1796 = vmatprep.subr.bf16.mxu0 %v1795_v39  ;;  %v194_v39 = vld [vmem:[#allocation3 + $0x270] sm:$0xff] }
  0x84   :  { %v1817_v49 = vpack.c.bf16 %v194_v39, %v192_v36  ;;  %v217_v39 = vld [vmem:[#allocation3 + $0x328] sm:$0xff] }
  0x85   :  { %1894 = vmatpush1.bf16.msra.mxu1 %v1893_v42  ;;  %v1915_v42 = vpack.c.bf16 %v493_v34, %v491_v33  ;;  %v113_v33 = vld [vmem:[%s2828_s0 + $0xb] sm:$0xff] }
  0x86   :  { %1798 = vmatpush1.bf16.msra.mxu0 %v1797_v47  ;;  %v475_v47 = vld [vmem:[%s2831_s3 + $0x108] sm:$0xff]  ;;  %1896 = vmatprep.subr.bf16.mxu1 %v1895_v44  ;;  %v492_v44 = vld [vmem:[%s2831_s3 + $0x190] sm:$0xff] }
  0x87   :  { %1800 = vmatprep.subr.bf16.mxu0 %v1799_v51  ;;  %v103_v51 = vld [vmem:[%s2828_s0 + $0x20] sm:$0xff]  ;;  %v1899_v58 = vpack.c.bf16 %v477_v48, %v475_v47  ;;  %v109_v34 = vld [vmem:[%s2828_s0 + $0xa] sm:$0xff] }
  0x89   :  { %1898 = vmatpush1.bf16.msra.mxu1 %v1897_v56  ;;  %v496_v56 = vld [vmem:[%s2831_s3 + $0x1b0] sm:$0xff] }
  0x8a   :  { %1802 = vmatpush1.bf16.msra.mxu0 %v1801_v59  ;;  %v474_v59 = vld [vmem:[%s2831_s3 + $0x100] sm:$0xff]  ;;  %1900 = vmatprep.subr.bf16.mxu1 %v1899_v58  ;;  %v501_v58 = vld [vmem:[%s2831_s3 + $0x1d8] sm:$0xff] }
  0x8b   :  { %1804 = vmatprep.subr.bf16.mxu0 %v1803_v61  ;;  %v479_v61 = vld [vmem:[%s2831_s3 + $0x128] sm:$0xff]  ;;  %v1901_v4 = vpack.c.bf16 %v476_v60, %v474_v59  ;;  %v1923_v2 = vpack.c.bf16 %v501_v58, %v499_v57 }
  0x8c   :  { %v1903_v6 = vpack.c.bf16 %v481_v62, %v479_v61  ;;  %v220_v61 = vld [vmem:[#allocation3 + $0x340] sm:$0xff]  ;;  %v222_v62 = vld [vmem:[#allocation3 + $0x350] sm:$0xff] }
  0x8d   :  { %321 = vmatmul.mubr.f32.vlgmr.msra.gmra.mrb[0].mxu0 %v100_v7  ;;  %v478_v7 = vld [vmem:[%s2831_s3 + $0x120] sm:$0xff]  ;;  %1902 = vmatpush1.bf16.msra.mxu1 %v1901_v4  ;;  %v1845_v3 = vpack.c.bf16 %v222_v62, %v220_v61 }
  0x8e   :  { %1806 = vmatpush1.bf16.msra.mxu0 %v1805_v8  ;;  %326 = vmatprep.mubr.f32.mxu0 %v105_v13  ;;  %v480_v8 = vld [vmem:[%s2831_s3 + $0x130] sm:$0xff]  ;;  %v204_v13 = vld [vmem:[#allocation3 + $0x2c0] sm:$0xff] }
  0x8f   :  { %1808 = vmatprep.subr.bf16.mxu0 %v1807_v10  ;;  %v485_v10 = vld [vmem:[%s2831_s3 + $0x158] sm:$0xff]  ;;  %v1905_v16 = vpack.c.bf16 %v480_v8, %v478_v7  ;;  %1904 = vmatprep.subr.bf16.mxu1 %v1903_v6  ;;  %v226_v6 = vld [vmem:[#allocation3 + $0x370] sm:$0xff]  ;;  %v229_v7 = vld [vmem:[#allocation3 + $0x388] sm:$0xff] }
  0x90   :  { %v1907_v18 = vpack.c.bf16 %v485_v10, %v483_v9  ;;  %v231_v8 = vld [vmem:[#allocation3 + $0x398] sm:$0xff]  ;;  %v1849_v9 = vpack.c.bf16 %v226_v6, %v224_v5 }
  0x91   :  { %327 = vmatmul.mubr.f32.gmra.mrb[2].mxu0 %v101_v23  ;;  %v1829_v23 = vpack.c.bf16 %v206_v14, %v204_v13  ;;  %1906 = vmatpush1.bf16.msra.mxu1 %v1905_v16  ;;  %v1851_v10 = vpack.c.bf16 %v231_v8, %v229_v7  ;;  %v233_v13 = vld [vmem:[#allocation3 + $0x3a8] sm:$0xff]  ;;  %v235_v14 = vld [vmem:[#allocation3 + $0x3b8] sm:$0xff] }
  0x92   :  { %1810 = vmatpush1.bf16.msra.mxu0 %v1809_v21  ;;  %332 = vmatprep.mubr.f32.mxu0 %v106_v27  ;;  %v487_v21 = vld [vmem:[%s2831_s3 + $0x168] sm:$0xff]  ;;  %v1855_v16 = vpack.c.bf16 %v235_v14, %v233_v13 }
  0x93   :  { %1812 = vmatprep.subr.bf16.mxu0 %v1811_v24  ;;  %v1831_v24 = vpack.c.bf16 %v211_v17, %v209_v15  ;;  %v213_v27 = vld [vmem:[#allocation3 + $0x308] sm:$0xff]  ;;  %1908 = vmatprep.subr.bf16.mxu1 %v1907_v18  ;;  %v1911_v30 = vpack.c.bf16 %v489_v22, %v487_v21  ;;  %v232_v17 = vld [vmem:[#allocation3 + $0x3a0] sm:$0xff]  ;;  %v234_v18 = vld [vmem:[#allocation3 + $0x3b0] sm:$0xff]  ;;  %v1859_v22 = vpack.c.bf16 %v239_v20, %v237_v19 }
  0x94   :  { %v1835_v36 = vpack.c.bf16 %v215_v29, %v213_v27  ;;  %v1857_v21 = vpack.c.bf16 %v234_v18, %v232_v17  ;;  %v240_v29 = vld [vmem:[#allocation3 + $0x3e0] sm:$0xff] }
  0x95   :  { %333 = vmatmul.mubr.f32.gmra.mrb[4].mxu0 %v102_v37  ;;  %v212_v37 = vld [vmem:[#allocation3 + $0x300] sm:$0xff]  ;;  %1910 = vmatpush1.bf16.msra.mxu1 %v1909_v28 }
  0x96   :  { %1814 = vmatpush1.bf16.msra.mxu0 %v1813_v35  ;;  %338 = vmatprep.mubr.f32.mxu0 %v107_v41  ;;  %v1833_v35 = vpack.c.bf16 %v210_v26, %v208_v25  ;;  %v219_v41 = vld [vmem:[#allocation3 + $0x338] sm:$0xff]  ;;  %v241_v25 = vld [vmem:[#allocation3 + $0x3e8] sm:$0xff] }
  0x97   :  { %1816 = vmatprep.subr.bf16.mxu0 %v1815_v38  ;;  %v214_v38 = vld [vmem:[#allocation3 + $0x310] sm:$0xff]  ;;  %1912 = vmatprep.subr.bf16.mxu1 %v1911_v30  ;;  %v1839_v48 = vpack.c.bf16 %v219_v41, %v217_v39  ;;  %v243_v26 = vld [vmem:[#allocation3 + $0x3f8] sm:$0xff]  ;;  %v498_v39 = vld [vmem:[%s2831_s3 + $0x1c0] sm:$0xff] }
  0x98   :  { %v1837_v47 = vpack.c.bf16 %v214_v38, %v212_v37  ;;  %v1863_v28 = vpack.c.bf16 %v243_v26, %v241_v25  ;;  %v242_v30 = vld [vmem:[#allocation3 + $0x3f0] sm:$0xff]  ;;  %v115_v37 = vld [vmem:[%s2828_s0 + $0x23] sm:$0xff] }
  0x99   :  { %339 = vmatmul.mubr.f32.gmra.mrb[6].mxu0 %v103_v51  ;;  %v221_v51 = vld [vmem:[#allocation3 + $0x348] sm:$0xff]  ;;  %1914 = vmatpush1.bf16.msra.mxu1 %v1913_v40  ;;  %v1865_v31 = vpack.c.bf16 %v242_v30, %v240_v29  ;;  %v500_v40 = vld [vmem:[%s2831_s3 + $0x1d0] sm:$0xff]  ;;  %v720_v29 = vld [vmem:[#allocation6 + $0x18] sm:$0xff] }
  0x9a   :  { %1818 = vmatpush1.bf16.msra.mxu0 %v1817_v49  ;;  %409 = vmatprep.mubr.f32.mxu0 %v112_v55  ;;  %v216_v49 = vld [vmem:[#allocation3 + $0x320] sm:$0xff]  ;;  %v1843_v60 = vpack.c.bf16 %v223_v53, %v221_v51  ;;  %v1925_v41 = vpack.c.bf16 %v500_v40, %v498_v39  ;;  %v601_v39 = vld [vmem:[%s2832_s4 + $0x10] sm:$0xff] }
  0x9b   :  { %1820 = vmatprep.subr.bf16.mxu0 %v1819_v52  ;;  %v1917_v52 = vpack.c.bf16 %v492_v44, %v490_v43  ;;  %1916 = vmatprep.subr.bf16.mxu1 %v1915_v42  ;;  %v494_v55 = vld [vmem:[%s2831_s3 + $0x1a0] sm:$0xff]  ;;  %v1841_v59 = vpack.c.bf16 %v218_v50, %v216_v49  ;;  %v503_v42 = vld [vmem:[%s2831_s3 + $0x1e8] sm:$0xff]  ;;  %v505_v43 = vld [vmem:[%s2831_s3 + $0x1f8] sm:$0xff] }
  0x9c   :  { %v111_v38 = vld [vmem:[%s2828_s0 + $0x22] sm:$0xff]  ;;  %v1927_v44 = vpack.c.bf16 %v505_v43, %v503_v42  ;;  %v244_v51 = vld [vmem:[%s2830_s2] sm:$0x3]  ;;  %v723_v42 = vld [vmem:[#allocation6 + $0x30] sm:$0xff] }
  0x9d   :  { %1918 = vmatpush1.bf16.msra.mxu1 %v1917_v52  ;;  %v726_v43 = vld [vmem:[#allocation6 + $0x48] sm:$0xff] }
  0x9e   :  { %1822 = vmatpush1.bf16.msra.mxu0 %v1821_v63  ;;  %v1921_v63 = vpack.c.bf16 %v496_v56, %v494_v55  ;;  %1920 = vmatprep.subr.bf16.mxu1 %v1919_v54 }
  0x9f   :  { %1824 = vmatprep.subr.bf16.mxu0 %v1823_v0  ;;  %v225_v0 = vld [vmem:[#allocation3 + $0x368] sm:$0xff] }
  0xa0   :  { %v1847_v4 = vpack.c.bf16 %v227_v1, %v225_v0 }
  0xa1   :  { %1922 = vmatpush1.bf16.msra.mxu1 %v1921_v63 }
  0xa2   :  { %1826 = vmatpush1.bf16.msra.mxu0 %v1825_v11  ;;  %1924 = vmatprep.subr.bf16.mxu1 %v1923_v2  ;;  %v228_v11 = vld [vmem:[#allocation3 + $0x380] sm:$0xff] }
  0xa3   :  { %1828 = vmatprep.subr.bf16.mxu0 %v1827_v12  ;;  %v230_v12 = vld [vmem:[#allocation3 + $0x390] sm:$0xff] }
  0xa4   :  { %v1853_v15 = vpack.c.bf16 %v230_v12, %v228_v11 }
  0xa5   :  { %1926 = vmatpush1.bf16.msra.mxu1 %v1925_v41  ;;  %v721_v41 = vld [vmem:[#allocation6 + $0x20] sm:$0xff] }
  0xa6   :  { %1830 = vmatpush1.bf16.msra.mxu0 %v1829_v23  ;;  %v236_v23 = vld [vmem:[#allocation3 + $0x3c0] sm:$0xff]  ;;  %1928 = vmatprep.subr.bf16.mxu1 %v1927_v44  ;;  %v728_v44 = vld [vmem:[#allocation6 + $0x58] sm:$0xff] }
  0xa7   :  { %1832 = vmatprep.subr.bf16.mxu0 %v1831_v24  ;;  %v238_v24 = vld [vmem:[#allocation3 + $0x3d0] sm:$0xff] }
  0xa8   :  { %v1861_v27 = vpack.c.bf16 %v238_v24, %v236_v23 }
  0xaa   :  { %1834 = vmatpush1.bf16.msra.mxu0 %v1833_v35  ;;  %v114_v35 = vld [vmem:[%s2828_s0 + $0x1b] sm:$0xff] }
  0xab   :  { %1836 = vmatprep.subr.bf16.mxu0 %v1835_v36  ;;  %v110_v36 = vld [vmem:[%s2828_s0 + $0x1a] sm:$0xff] }
  0xae   :  { %1838 = vmatpush1.bf16.msra.mxu0 %v1837_v47  ;;  %v1929_v47 = vpack.c.bf16 %v504_v46, %v502_v45  ;;  %v602_v45 = vld [vmem:[%s2832_s4 + $0x18] sm:$0xff]  ;;  %v1945_v46 = vpack.c.bf16 %v723_v42, %v721_v41  ;;  %v761_v41 = vld [vmem:[#allocation6 + $0x160] sm:$0xff]  ;;  %v763_v42 = vld [vmem:[#allocation6 + $0x170] sm:$0xff] }
  0xaf   :  { %1840 = vmatprep.subr.bf16.mxu0 %v1839_v48  ;;  %v246_v48 = vlaneseq }
  0xb0   :  { %1930 = vmatpush1.bf16.msra.mxu1 %v1929_v47  ;;  %v1947_v47 = vpack.c.bf16 %v728_v44, %v726_v43  ;;  %v1985_v43 = vpack.c.bf16 %v763_v42, %v761_v41  ;;  %v766_v44 = vld [vmem:[#allocation6 + $0x188] sm:$0xff]  ;;  %v1038_v41 = vld [vmem:[#allocation8 + $0xb8] sm:$0xff] }
  0xb1   :  { %v2742_v49 = vshrl.u32 %v246_v48, 7  ;;  %v725_v48 = vld [vmem:[#allocation6 + $0x40] sm:$0xff] }
  0xb2   :  { %1842 = vmatpush1.bf16.msra.mxu0 %v1841_v59 }
  0xb3   :  { %1844 = vmatprep.subr.bf16.mxu0 %v1843_v60  ;;  %v248_v50 = vsub.s32 0, %v2742_v49  ;;  %v252_v52 = vsub.s32 1, %v2742_v49  ;;  %v1158_v49 = vld [vmem:[%s2836_s8] sm:$0xff] }
  0xb5   :  { %v249_v53 = vrot.slane %v244_v51, %v248_v50  ;;  %v253_v54 = vrot.slane %v244_v51, %v252_v52  ;;  %v727_v51 = vld [vmem:[#allocation6 + $0x50] sm:$0xff] }
  0xb6   :  { %1846 = vmatpush1.bf16.msra.mxu0 %v1845_v3 }
  0xb7   :  { %1848 = vmatprep.subr.bf16.mxu0 %v1847_v4 }
  0xba   :  { %1850 = vmatpush1.bf16.msra.mxu0 %v1849_v9 }
  0xbb   :  { %1852 = vmatprep.subr.bf16.mxu0 %v1851_v10 }
  0xbe   :  { %1854 = vmatpush1.bf16.msra.mxu0 %v1853_v15  ;;  %v599_v15 = vld [vmem:[%s2832_s4] sm:$0xff] }
  0xbf   :  { %1856 = vmatprep.subr.bf16.mxu0 %v1855_v16 }
  0xc2   :  { %1858 = vmatpush1.bf16.msra.mxu0 %v1857_v21 }
  0xc3   :  { %1860 = vmatprep.subr.bf16.mxu0 %v1859_v22 }
  0xc6   :  { %1862 = vmatpush1.bf16.msra.mxu0 %v1861_v27 }
  0xc7   :  { %1864 = vmatprep.subr.bf16.mxu0 %v1863_v28  ;;  %v718_v28 = vld [vmem:[#allocation6 + $0x8] sm:$0xff] }
  0xca   :  { %1866 = vmatpush1.bf16.msra.mxu0 %v1865_v31 }
  0xcd   :  { %410 = vmatmul.mubr.f32.vlgmr.msra.gmra.mrb[0].mxu0 %v108_v32  ;;  %v1939_v32 = vpack.c.bf16 %v720_v29, %v718_v28  ;;  %v753_v29 = vld [vmem:[#allocation6 + $0x120] sm:$0xff] }
  0xce   :  { %415 = vmatprep.mubr.f32.mxu0 %v113_v33  ;;  %v717_v33 = vld [vmem:[#allocation6] sm:$0xff] }
  0xd1   :  { %416 = vmatmul.mubr.f32.gmra.mrb[2].mxu0 %v109_v34  ;;  %v719_v34 = vld [vmem:[#allocation6 + $0x10] sm:$0xff] }
  0xd2   :  { %421 = vmatprep.mubr.f32.mxu0 %v114_v35  ;;  %v722_v35 = vld [vmem:[#allocation6 + $0x28] sm:$0xff] }
  0xd5   :  { %422 = vmatmul.mubr.f32.gmra.mrb[4].mxu0 %v110_v36  ;;  %v724_v36 = vld [vmem:[#allocation6 + $0x38] sm:$0xff] }
  0xd6   :  { %427 = vmatprep.mubr.f32.mxu0 %v115_v37  ;;  %v600_v37 = vld [vmem:[%s2832_s4 + $0x8] sm:$0xff]  ;;  %v1943_v40 = vpack.c.bf16 %v724_v36, %v722_v35  ;;  %v757_v35 = vld [vmem:[#allocation6 + $0x140] sm:$0xff]  ;;  %v759_v36 = vld [vmem:[#allocation6 + $0x150] sm:$0xff] }
  0xd9   :  { %428 = vmatmul.mubr.f32.gmra.mrb[6].mxu0 %v111_v38  ;;  %v1941_v38 = vpack.c.bf16 %v719_v34, %v717_v33 }
 0x1a0   :  { %v411_v55 = vpop.f32.mrb[0].mxu0 }
 0x1a1   :  { %v2199_v56 = vadd.f32 %v411_v55, %v249_v53  ;;  %v413_v57 = vpop.f32.mrb[1].mxu0  ;;  %v1949_v55 = vpack.c.bf16 %v727_v51, %v725_v48  ;;  %v767_v48 = vld [vmem:[#allocation6 + $0x190] sm:$0xff] }
 0x1a2   :  { %v2200_v58 = vadd.f32 %v413_v57, %v253_v54  ;;  %v729_v57 = vld [vmem:[#allocation6 + $0x60] sm:$0xff] }
 0x1a3   :  { %v434_v61 = vmax.f32 %v2199_v56, 0.0 }
 0x1a4   :  { %v417_v59 = vpop.f32.mrb[2].mxu0  ;;  %v435_v60 = vmax.f32 %v2200_v58, 0.0  ;;  %v731_v58 = vld [vmem:[#allocation6 + $0x70] sm:$0xff] }
 0x1a5   :  { %v2201_v62 = vadd.f32 %v417_v59, %v249_v53  ;;  %v419_v63 = vpop.f32.mrb[3].mxu0  ;;  %v734_v59 = vld [vmem:[#allocation6 + $0x88] sm:$0xff] }
 0x1a6   :  { %v2202_v0 = vadd.f32 %v419_v63, %v253_v54  ;;  %570 = vmatprep.mubr.f32.mxu1 %v435_v60  ;;  %v736_v60 = vld [vmem:[#allocation6 + $0x98] sm:$0xff]  ;;  %v733_v63 = vld [vmem:[#allocation6 + $0x80] sm:$0xff] }
 0x1a7   :  { %571 = vmatmul.mubr.f32.vlgmr.msra.gmra.mrb[0].mxu1 %v434_v61  ;;  %v436_v3 = vmax.f32 %v2201_v62, 0.0  ;;  %v1953_v61 = vpack.c.bf16 %v731_v58, %v729_v57  ;;  %v1955_v62 = vpack.c.bf16 %v736_v60, %v734_v59  ;;  %v771_v57 = vld [vmem:[#allocation6 + $0x1b0] sm:$0xff]  ;;  %v774_v59 = vld [vmem:[#allocation6 + $0x1c8] sm:$0xff]  ;;  %v776_v60 = vld [vmem:[#allocation6 + $0x1d8] sm:$0xff] }
 0x1a8   :  { %v437_v1 = vmax.f32 %v2202_v0, 0.0  ;;  %v423_v2 = vpop.f32.mrb[4].mxu0  ;;  %v735_v0 = vld [vmem:[#allocation6 + $0x90] sm:$0xff] }
 0x1a9   :  { %v2203_v4 = vadd.f32 %v423_v2, %v249_v53  ;;  %v425_v5 = vpop.f32.mrb[5].mxu0  ;;  %v740_v2 = vld [vmem:[#allocation6 + $0xb8] sm:$0xff] }
 0x1aa   :  { %v2204_v6 = vadd.f32 %v425_v5, %v253_v54  ;;  %576 = vmatprep.mubr.f32.mxu1 %v437_v1  ;;  %v738_v1 = vld [vmem:[#allocation6 + $0xa8] sm:$0xff]  ;;  %v737_v5 = vld [vmem:[#allocation6 + $0xa0] sm:$0xff] }
 0x1ab   :  { %577 = vmatmul.mubr.f32.gmra.mrb[2].mxu1 %v436_v3  ;;  %v438_v9 = vmax.f32 %v2203_v4, 0.0  ;;  %v1957_v3 = vpack.c.bf16 %v735_v0, %v733_v63  ;;  %v1959_v4 = vpack.c.bf16 %v740_v2, %v738_v1  ;;  %v775_v63 = vld [vmem:[#allocation6 + $0x1d0] sm:$0xff]  ;;  %v2359_v1 = vmov 0.0   ;;  %v778_v2 = vld [vmem:[#allocation6 + $0x1e8] sm:$0xff] }
 0x1ac   :  { %v439_v7 = vmax.f32 %v2204_v6, 0.0  ;;  %v429_v8 = vpop.f32.mrb[6].mxu0  ;;  %v739_v6 = vld [vmem:[#allocation6 + $0xb0] sm:$0xff]  ;;  %703 = vst [vmem:[#allocation2] sm:$0x3] %v2359_v1 }
 0x1ad   :  { %v2205_v10 = vadd.f32 %v429_v8, %v249_v53  ;;  %v431_v11 = vpop.f32.mrb[7].mxu0  ;;  %v730_v53 = vld [vmem:[#allocation6 + $0x68] sm:$0xff]  ;;  %v744_v8 = vld [vmem:[#allocation6 + $0xd8] sm:$0xff]  ;;  %704 = vst [vmem:[#allocation2 + $0x10] sm:$0x3] %v2359_v1 }
 0x1ae   :  { %v2206_v12 = vadd.f32 %v431_v11, %v253_v54  ;;  %582 = vmatprep.mubr.f32.mxu1 %v439_v7  ;;  %v732_v54 = vld [vmem:[#allocation6 + $0x78] sm:$0xff]  ;;  %v742_v7 = vld [vmem:[#allocation6 + $0xc8] sm:$0xff]  ;;  %v741_v11 = vld [vmem:[#allocation6 + $0xc0] sm:$0xff]  ;;  %705 = vst [vmem:[#allocation2 + $0xa] sm:$0x3] %v2359_v1 }
 0x1af   :  { %583 = vmatmul.mubr.f32.gmra.mrb[4].mxu1 %v438_v9  ;;  %v440_v14 = vmax.f32 %v2205_v10, 0.0  ;;  %v1951_v56 = vpack.c.bf16 %v732_v54, %v730_v53  ;;  %v1961_v9 = vpack.c.bf16 %v739_v6, %v737_v5  ;;  %v1963_v10 = vpack.c.bf16 %v744_v8, %v742_v7  ;;  %v770_v53 = vld [vmem:[#allocation6 + $0x1a8] sm:$0xff]  ;;  %v772_v54 = vld [vmem:[#allocation6 + $0x1b8] sm:$0xff]  ;;  %706 = vst [vmem:[#allocation2 + $0x1a] sm:$0x3] %v2359_v1  ;;  %v779_v6 = vld [vmem:[#allocation6 + $0x1f0] sm:$0xff] }
 0x1b0   :  { %v441_v13 = vmax.f32 %v2206_v12, 0.0  ;;  %v743_v12 = vld [vmem:[#allocation6 + $0xd0] sm:$0xff]  ;;  %v782_v8 = vld [vmem:[#allocation6 + $0x208] sm:$0xff] }
 0x1b2   :  { %588 = vmatprep.mubr.f32.mxu1 %v441_v13  ;;  %v746_v13 = vld [vmem:[#allocation6 + $0xe8] sm:$0xff] }
 0x1b3   :  { %589 = vmatmul.mubr.f32.gmra.mrb[6].mxu1 %v440_v14  ;;  %v748_v14 = vld [vmem:[#allocation6 + $0xf8] sm:$0xff] }
 0x1b4   :  { %1726 = vmatprep.mubr.msk.f32.mxu1 %vm603_vm0, %v599_v15  ;;  %v1965_v15 = vpack.c.bf16 %v743_v12, %v741_v11  ;;  %v1016_v11 = vld [vmem:[#allocation8 + $0x8] sm:$0xff]  ;;  %v1018_v12 = vld [vmem:[#allocation8 + $0x18] sm:$0xff] }
 0x27a   :  { %v572_v16 = vpop.f32.mrb[0].mxu1 }
 0x27b   :  { %v574_v17 = vpop.f32.mrb[1].mxu1 }
 0x27c   :  { %v595_v18 = vmax.f32 %v572_v16, %v574_v17  ;;  %v1967_v16 = vpack.c.bf16 %v748_v14, %v746_v13  ;;  %v745_v17 = vld [vmem:[#allocation6 + $0xe0] sm:$0xff]  ;;  %v2067_v14 = vpack.c.bf16 %v1018_v12, %v1016_v11  ;;  %v1058_v11 = vld [vmem:[#allocation8 + $0x158] sm:$0xff] }
 0x27d   :  { %v1015_v13 = vld [vmem:[#allocation8] sm:$0xff] }
 0x27e   :  { %v578_v19 = vpop.f32.mrb[2].mxu1  ;;  %2068 = vmatprep.subr.bf16.mxu0 %v2067_v14  ;;  %v1055_v14 = vld [vmem:[#allocation8 + $0x140] sm:$0xff] }
 0x27f   :  { %v580_v20 = vpop.f32.mrb[3].mxu1 }
 0x280   :  { %v596_v21 = vmax.f32 %v578_v19, %v580_v20  ;;  %v750_v19 = vld [vmem:[#allocation6 + $0x108] sm:$0xff]  ;;  %v752_v20 = vld [vmem:[#allocation6 + $0x118] sm:$0xff] }
 0x282   :  { %v1931_v22 = vpack.c.bf16 %v596_v21, %v595_v18  ;;  %v584_v23 = vpop.f32.mrb[4].mxu1  ;;  %v747_v18 = vld [vmem:[#allocation6 + $0xf0] sm:$0xff] }
 0x283   :  { %v586_v24 = vpop.f32.mrb[5].mxu1  ;;  %v1969_v21 = vpack.c.bf16 %v747_v18, %v745_v17  ;;  %v1022_v17 = vld [vmem:[#allocation8 + $0x38] sm:$0xff] }
 0x284   :  { %v597_v25 = vmax.f32 %v584_v23, %v586_v24  ;;  %1932 = vmatprep.subr.bf16.mxu1 %v1931_v22  ;;  %v749_v23 = vld [vmem:[#allocation6 + $0x100] sm:$0xff]  ;;  %v751_v24 = vld [vmem:[#allocation6 + $0x110] sm:$0xff] }
 0x285   :  { %1934 = vmatpush3.bf16.msra.mxu1 %v1931_v22  ;;  %v1971_v22 = vpack.c.bf16 %v752_v20, %v750_v19  ;;  %v1019_v20 = vld [vmem:[#allocation8 + $0x20] sm:$0xff] }
 0x286   :  { %v590_v26 = vpop.f32.mrb[6].mxu1 }
 0x287   :  { %v592_v27 = vpop.f32.mrb[7].mxu1 }
 0x288   :  { %v598_v30 = vmax.f32 %v590_v26, %v592_v27  ;;  %v756_v26 = vld [vmem:[#allocation6 + $0x138] sm:$0xff]  ;;  %v1973_v27 = vpack.c.bf16 %v751_v24, %v749_v23 }
 0x289   :  { %v1026_v23 = vld [vmem:[#allocation8 + $0x58] sm:$0xff] }
 0x28a   :  { %v1935_v31 = vpack.c.bf16 %v598_v30, %v597_v25  ;;  %v754_v25 = vld [vmem:[#allocation6 + $0x128] sm:$0xff]  ;;  %v755_v30 = vld [vmem:[#allocation6 + $0x130] sm:$0xff] }
 0x28b   :  { %v1975_v28 = vpack.c.bf16 %v756_v26, %v754_v25  ;;  %v1977_v33 = vpack.c.bf16 %v755_v30, %v753_v29  ;;  %v1023_v26 = vld [vmem:[#allocation8 + $0x40] sm:$0xff]  ;;  %v1030_v29 = vld [vmem:[#allocation8 + $0x78] sm:$0xff] }
 0x28c   :  { %1936 = vmatprep.subr.bf16.mxu1 %v1935_v31 }
 0x28d   :  { %1938 = vmatpush3.bf16.msra.mxu1 %v1935_v31  ;;  %v758_v31 = vld [vmem:[#allocation6 + $0x148] sm:$0xff] }
 0x28e   :  { %1940 = vmatprep.subr.bf16.mxu1 %v1939_v32  ;;  %v760_v32 = vld [vmem:[#allocation6 + $0x158] sm:$0xff] }
 0x28f   :  { %v1979_v34 = vpack.c.bf16 %v760_v32, %v758_v31  ;;  %v1027_v32 = vld [vmem:[#allocation8 + $0x60] sm:$0xff] }
 0x290   :  { %1727 = vmatmul.mubr.msk.f32.vlgmr.msra.gmra.mrb[8].mxu1 %vm603_vm0, %v600_v37  ;;  %v762_v37 = vld [vmem:[#allocation6 + $0x168] sm:$0xff] }
 0x291   :  { %1729 = vmatprep.mubr.msk.f32.mxu1 %vm603_vm0, %v601_v39  ;;  %1942 = vmatpush1.bf16.msra.mxu1 %v1941_v38  ;;  %v764_v38 = vld [vmem:[#allocation6 + $0x178] sm:$0xff]  ;;  %v1981_v39 = vpack.c.bf16 %v759_v36, %v757_v35 }
 0x292   :  { %1944 = vmatprep.subr.bf16.mxu1 %v1943_v40  ;;  %v1983_v40 = vpack.c.bf16 %v764_v38, %v762_v37  ;;  %v1034_v35 = vld [vmem:[#allocation8 + $0x98] sm:$0xff]  ;;  %v1031_v38 = vld [vmem:[#allocation8 + $0x80] sm:$0xff] }
 0x294   :  { %1730 = vmatmul.mubr.msk.f32.gmra.mrb[10].mxu1 %vm603_vm0, %v602_v45  ;;  %v768_v45 = vld [vmem:[#allocation6 + $0x198] sm:$0xff] }
 0x295   :  { %1946 = vmatpush1.bf16.msra.mxu1 %v1945_v46  ;;  %v1987_v46 = vpack.c.bf16 %v768_v45, %v766_v44  ;;  %v1035_v44 = vld [vmem:[#allocation8 + $0xa0] sm:$0xff]  ;;  %v1037_v45 = vld [vmem:[#allocation8 + $0xb0] sm:$0xff] }
 0x296   :  { %1948 = vmatprep.subr.bf16.mxu1 %v1947_v47  ;;  %v765_v47 = vld [vmem:[#allocation6 + $0x180] sm:$0xff] }
 0x297   :  { %v1989_v51 = vpack.c.bf16 %v767_v48, %v765_v47  ;;  %v1042_v47 = vld [vmem:[#allocation8 + $0xd8] sm:$0xff]  ;;  %v2089_v48 = vpack.c.bf16 %v1037_v45, %v1035_v44  ;;  %v781_v44 = vld [vmem:[#allocation6 + $0x200] sm:$0xff]  ;;  %v783_v45 = vld [vmem:[#allocation6 + $0x210] sm:$0xff] }
 0x299   :  { %1950 = vmatpush1.bf16.msra.mxu1 %v1949_v55  ;;  %v1991_v55 = vpack.c.bf16 %v772_v54, %v770_v53  ;;  %v1039_v53 = vld [vmem:[#allocation8 + $0xc0] sm:$0xff]  ;;  %v1041_v54 = vld [vmem:[#allocation8 + $0xd0] sm:$0xff] }
 0x29a   :  { %1952 = vmatprep.subr.bf16.mxu1 %v1951_v56  ;;  %v769_v56 = vld [vmem:[#allocation6 + $0x1a0] sm:$0xff] }
 0x29b   :  { %v1993_v58 = vpack.c.bf16 %v771_v57, %v769_v56  ;;  %v1046_v56 = vld [vmem:[#allocation8 + $0xf8] sm:$0xff]  ;;  %v2093_v57 = vpack.c.bf16 %v1041_v54, %v1039_v53 }
 0x29d   :  { %1954 = vmatpush1.bf16.msra.mxu1 %v1953_v61  ;;  %v1995_v61 = vpack.c.bf16 %v776_v60, %v774_v59  ;;  %v1043_v59 = vld [vmem:[#allocation8 + $0xe0] sm:$0xff]  ;;  %v1045_v60 = vld [vmem:[#allocation8 + $0xf0] sm:$0xff] }
 0x29e   :  { %1956 = vmatprep.subr.bf16.mxu1 %v1955_v62  ;;  %v773_v62 = vld [vmem:[#allocation6 + $0x1c0] sm:$0xff] }
 0x29f   :  { %v1997_v0 = vpack.c.bf16 %v775_v63, %v773_v62  ;;  %v1050_v62 = vld [vmem:[#allocation8 + $0x118] sm:$0xff]  ;;  %v2097_v63 = vpack.c.bf16 %v1045_v60, %v1043_v59 }
 0x2a1   :  { %1958 = vmatpush1.bf16.msra.mxu1 %v1957_v3  ;;  %v780_v3 = vld [vmem:[#allocation6 + $0x1f8] sm:$0xff] }
 0x2a2   :  { %1960 = vmatprep.subr.bf16.mxu1 %v1959_v4  ;;  %v777_v4 = vld [vmem:[#allocation6 + $0x1e0] sm:$0xff]  ;;  %v1999_v5 = vpack.c.bf16 %v780_v3, %v778_v2  ;;  %v1049_v3 = vld [vmem:[#allocation8 + $0x110] sm:$0xff] }
 0x2a3   :  { %v2001_v7 = vpack.c.bf16 %v779_v6, %v777_v4  ;;  %v1047_v2 = vld [vmem:[#allocation8 + $0x100] sm:$0xff]  ;;  %v1052_v4 = vld [vmem:[#allocation8 + $0x128] sm:$0xff] }
 0x2a4   :  { %v2101_v6 = vpack.c.bf16 %v1049_v3, %v1047_v2  ;;  %v794_v2 = vld [vmem:[#allocation6 + $0x268] sm:$0xff]  ;;  %v796_v3 = vld [vmem:[#allocation6 + $0x278] sm:$0xff] }
 0x2a5   :  { %1962 = vmatpush1.bf16.msra.mxu1 %v1961_v9  ;;  %v784_v9 = vld [vmem:[#allocation6 + $0x218] sm:$0xff] }
 0x2a6   :  { %1964 = vmatprep.subr.bf16.mxu1 %v1963_v10  ;;  %v2003_v10 = vpack.c.bf16 %v784_v9, %v782_v8  ;;  %v1051_v8 = vld [vmem:[#allocation8 + $0x120] sm:$0xff]  ;;  %v1053_v9 = vld [vmem:[#allocation8 + $0x130] sm:$0xff] }
 0x2a7   :  { %v2105_v12 = vpack.c.bf16 %v1053_v9, %v1051_v8  ;;  %v795_v8 = vld [vmem:[#allocation6 + $0x270] sm:$0xff]  ;;  %v798_v9 = vld [vmem:[#allocation6 + $0x288] sm:$0xff] }
 0x2a9   :  { %1966 = vmatpush1.bf16.msra.mxu1 %v1965_v15  ;;  %v1017_v15 = vld [vmem:[#allocation8 + $0x10] sm:$0xff] }
 0x2aa   :  { %1968 = vmatprep.subr.bf16.mxu1 %v1967_v16  ;;  %v1020_v16 = vld [vmem:[#allocation8 + $0x28] sm:$0xff]  ;;  %v2069_v18 = vpack.c.bf16 %v1017_v15, %v1015_v13  ;;  %v1057_v15 = vld [vmem:[#allocation8 + $0x150] sm:$0xff] }
 0x2ab   :  { %v2071_v19 = vpack.c.bf16 %v1022_v17, %v1020_v16  ;;  %v1060_v16 = vld [vmem:[#allocation8 + $0x168] sm:$0xff]  ;;  %v1062_v17 = vld [vmem:[#allocation8 + $0x178] sm:$0xff] }
 0x2ac   :  { %2070 = vmatpush1.bf16.msra.mxu0 %v2069_v18  ;;  %v2109_v18 = vpack.c.bf16 %v1057_v15, %v1055_v14  ;;  %v799_v14 = vld [vmem:[#allocation6 + $0x290] sm:$0xff]  ;;  %v802_v15 = vld [vmem:[#allocation6 + $0x2a8] sm:$0xff] }
 0x2ad   :  { %1970 = vmatpush1.bf16.msra.mxu1 %v1969_v21  ;;  %v1021_v21 = vld [vmem:[#allocation8 + $0x30] sm:$0xff]  ;;  %2072 = vmatprep.subr.bf16.mxu0 %v2071_v19  ;;  %v2111_v19 = vpack.c.bf16 %v1062_v17, %v1060_v16  ;;  %v804_v16 = vld [vmem:[#allocation6 + $0x2b8] sm:$0xff] }
 0x2ae   :  { %1972 = vmatprep.subr.bf16.mxu1 %v1971_v22  ;;  %v1024_v22 = vld [vmem:[#allocation8 + $0x48] sm:$0xff]  ;;  %v2073_v24 = vpack.c.bf16 %v1021_v21, %v1019_v20  ;;  %v1059_v20 = vld [vmem:[#allocation8 + $0x160] sm:$0xff]  ;;  %v1061_v21 = vld [vmem:[#allocation8 + $0x170] sm:$0xff] }
 0x2af   :  { %v2075_v25 = vpack.c.bf16 %v1026_v23, %v1024_v22  ;;  %v1064_v22 = vld [vmem:[#allocation8 + $0x188] sm:$0xff]  ;;  %v1066_v23 = vld [vmem:[#allocation8 + $0x198] sm:$0xff] }
 0x2b0   :  { %2074 = vmatpush1.bf16.msra.mxu0 %v2073_v24 }
 0x2b1   :  { %1974 = vmatpush1.bf16.msra.mxu1 %v1973_v27  ;;  %v1025_v27 = vld [vmem:[#allocation8 + $0x50] sm:$0xff]  ;;  %2076 = vmatprep.subr.bf16.mxu0 %v2075_v25 }
 0x2b2   :  { %1976 = vmatprep.subr.bf16.mxu1 %v1975_v28  ;;  %v1028_v28 = vld [vmem:[#allocation8 + $0x68] sm:$0xff]  ;;  %v2077_v30 = vpack.c.bf16 %v1025_v27, %v1023_v26  ;;  %v2113_v26 = vpack.c.bf16 %v1061_v21, %v1059_v20  ;;  %v2115_v27 = vpack.c.bf16 %v1066_v23, %v1064_v22  ;;  %v803_v20 = vld [vmem:[#allocation6 + $0x2b0] sm:$0xff]  ;;  %v808_v22 = vld [vmem:[#allocation6 + $0x2d8] sm:$0xff] }
 0x2b3   :  { %v2079_v31 = vpack.c.bf16 %v1030_v29, %v1028_v28  ;;  %v1063_v28 = vld [vmem:[#allocation8 + $0x180] sm:$0xff]  ;;  %v1065_v29 = vld [vmem:[#allocation8 + $0x190] sm:$0xff]  ;;  %v806_v21 = vld [vmem:[#allocation6 + $0x2c8] sm:$0xff] }
 0x2b4   :  { %2078 = vmatpush1.bf16.msra.mxu0 %v2077_v30  ;;  %v1068_v30 = vld [vmem:[#allocation8 + $0x1a8] sm:$0xff] }
 0x2b5   :  { %1978 = vmatpush1.bf16.msra.mxu1 %v1977_v33  ;;  %v1029_v33 = vld [vmem:[#allocation8 + $0x70] sm:$0xff]  ;;  %2080 = vmatprep.subr.bf16.mxu0 %v2079_v31  ;;  %v1070_v31 = vld [vmem:[#allocation8 + $0x1b8] sm:$0xff] }
 0x2b6   :  { %1980 = vmatprep.subr.bf16.mxu1 %v1979_v34  ;;  %v1032_v34 = vld [vmem:[#allocation8 + $0x88] sm:$0xff]  ;;  %v2081_v36 = vpack.c.bf16 %v1029_v33, %v1027_v32 }
 0x2b7   :  { %v2083_v37 = vpack.c.bf16 %v1034_v35, %v1032_v34  ;;  %v2117_v35 = vpack.c.bf16 %v1065_v29, %v1063_v28  ;;  %v812_v28 = vld [vmem:[#allocation6 + $0x2f8] sm:$0xff] }
 0x2b8   :  { %2082 = vmatpush1.bf16.msra.mxu0 %v2081_v36 }
 0x2b9   :  { %1982 = vmatpush1.bf16.msra.mxu1 %v1981_v39  ;;  %v1033_v39 = vld [vmem:[#allocation8 + $0x90] sm:$0xff]  ;;  %2084 = vmatprep.subr.bf16.mxu0 %v2083_v37  ;;  %v2119_v37 = vpack.c.bf16 %v1070_v31, %v1068_v30  ;;  %v809_v31 = vld [vmem:[#allocation6 + $0x2e0] sm:$0xff] }
 0x2ba   :  { %1984 = vmatprep.subr.bf16.mxu1 %v1983_v40  ;;  %v1036_v40 = vld [vmem:[#allocation8 + $0xa8] sm:$0xff]  ;;  %v2085_v42 = vpack.c.bf16 %v1033_v39, %v1031_v38  ;;  %v1067_v38 = vld [vmem:[#allocation8 + $0x1a0] sm:$0xff]  ;;  %v1069_v39 = vld [vmem:[#allocation8 + $0x1b0] sm:$0xff] }
 0x2bc   :  { %2086 = vmatpush1.bf16.msra.mxu0 %v2085_v42  ;;  %v2121_v42 = vpack.c.bf16 %v1069_v39, %v1067_v38  ;;  %v813_v39 = vld [vmem:[#allocation6 + $0x300] sm:$0xff] }
 0x2bd   :  { %1986 = vmatpush1.bf16.msra.mxu1 %v1985_v43  ;;  %v2087_v43 = vpack.c.bf16 %v1038_v41, %v1036_v40  ;;  %v1072_v40 = vld [vmem:[#allocation8 + $0x1c8] sm:$0xff]  ;;  %v1074_v41 = vld [vmem:[#allocation8 + $0x1d8] sm:$0xff] }
 0x2be   :  { %1988 = vmatprep.subr.bf16.mxu1 %v1987_v46  ;;  %v1040_v46 = vld [vmem:[#allocation8 + $0xc8] sm:$0xff] }
 0x2bf   :  { %2088 = vmatprep.subr.bf16.mxu0 %v2087_v43  ;;  %v2123_v43 = vpack.c.bf16 %v1074_v41, %v1072_v40  ;;  %v815_v40 = vld [vmem:[#allocation6 + $0x310] sm:$0xff]  ;;  %v818_v41 = vld [vmem:[#allocation6 + $0x328] sm:$0xff] }
 0x2c0   :  { %2090 = vmatpush1.bf16.msra.mxu0 %v2089_v48  ;;  %v2005_v48 = vpack.c.bf16 %v783_v45, %v781_v44  ;;  %v817_v45 = vld [vmem:[#allocation6 + $0x320] sm:$0xff] }
 0x2c1   :  { %1990 = vmatpush1.bf16.msra.mxu1 %v1989_v51  ;;  %v2091_v51 = vpack.c.bf16 %v1042_v47, %v1040_v46  ;;  %v786_v46 = vld [vmem:[#allocation6 + $0x228] sm:$0xff]  ;;  %v788_v47 = vld [vmem:[#allocation6 + $0x238] sm:$0xff] }
 0x2c2   :  { %1992 = vmatprep.subr.bf16.mxu1 %v1991_v55  ;;  %v1044_v55 = vld [vmem:[#allocation8 + $0xe8] sm:$0xff] }
 0x2c3   :  { %2092 = vmatprep.subr.bf16.mxu0 %v2091_v51  ;;  %v785_v51 = vld [vmem:[#allocation6 + $0x220] sm:$0xff] }
 0x2c4   :  { %2094 = vmatpush1.bf16.msra.mxu0 %v2093_v57  ;;  %v790_v57 = vld [vmem:[#allocation6 + $0x248] sm:$0xff] }
 0x2c5   :  { %1994 = vmatpush1.bf16.msra.mxu1 %v1993_v58  ;;  %v2095_v58 = vpack.c.bf16 %v1046_v56, %v1044_v55  ;;  %v2007_v55 = vpack.c.bf16 %v788_v47, %v786_v46  ;;  %v787_v56 = vld [vmem:[#allocation6 + $0x230] sm:$0xff]  ;;  %v822_v47 = vld [vmem:[#allocation6 + $0x348] sm:$0xff] }
 0x2c6   :  { %1996 = vmatprep.subr.bf16.mxu1 %v1995_v61  ;;  %v1048_v61 = vld [vmem:[#allocation8 + $0x108] sm:$0xff]  ;;  %v2009_v60 = vpack.c.bf16 %v787_v56, %v785_v51  ;;  %v819_v46 = vld [vmem:[#allocation6 + $0x330] sm:$0xff] }
 0x2c7   :  { %2096 = vmatprep.subr.bf16.mxu0 %v2095_v58  ;;  %v792_v58 = vld [vmem:[#allocation6 + $0x258] sm:$0xff]  ;;  %v2041_v51 = vpack.c.bf16 %v819_v46, %v817_v45  ;;  %v826_v56 = vld [vmem:[#allocation6 + $0x368] sm:$0xff] }
 0x2c8   :  { %2098 = vmatpush1.bf16.msra.mxu0 %v2097_v63  ;;  %v791_v63 = vld [vmem:[#allocation6 + $0x250] sm:$0xff] }
 0x2c9   :  { %1998 = vmatpush1.bf16.msra.mxu1 %v1997_v0  ;;  %v2099_v0 = vpack.c.bf16 %v1050_v62, %v1048_v61  ;;  %v2011_v61 = vpack.c.bf16 %v792_v58, %v790_v57  ;;  %v789_v62 = vld [vmem:[#allocation6 + $0x240] sm:$0xff]  ;;  %v828_v57 = vld [vmem:[#allocation6 + $0x378] sm:$0xff] }
 0x2ca   :  { %2000 = vmatprep.subr.bf16.mxu1 %v1999_v5  ;;  %v1054_v5 = vld [vmem:[#allocation8 + $0x138] sm:$0xff] }
 0x2cb   :  { %2100 = vmatprep.subr.bf16.mxu0 %v2099_v0 }
 0x2cc   :  { %2102 = vmatpush1.bf16.msra.mxu0 %v2101_v6  ;;  %v2015_v6 = vpack.c.bf16 %v796_v3, %v794_v2  ;;  %v829_v3 = vld [vmem:[#allocation6 + $0x380] sm:$0xff] }
 0x2cd   :  { %2002 = vmatpush1.bf16.msra.mxu1 %v2001_v7  ;;  %v2103_v7 = vpack.c.bf16 %v1054_v5, %v1052_v4  ;;  %v2013_v5 = vpack.c.bf16 %v791_v63, %v789_v62  ;;  %v830_v62 = vld [vmem:[#allocation6 + $0x388] sm:$0xff]  ;;  %v832_v63 = vld [vmem:[#allocation6 + $0x398] sm:$0xff] }
 0x2ce   :  { %2004 = vmatprep.subr.bf16.mxu1 %v2003_v10  ;;  %v1056_v10 = vld [vmem:[#allocation8 + $0x148] sm:$0xff]  ;;  %v2051_v2 = vpack.c.bf16 %v832_v63, %v830_v62 }
 0x2cf   :  { %2104 = vmatprep.subr.bf16.mxu0 %v2103_v7  ;;  %v2107_v13 = vpack.c.bf16 %v1058_v11, %v1056_v10  ;;  %v793_v7 = vld [vmem:[#allocation6 + $0x260] sm:$0xff]  ;;  %v800_v10 = vld [vmem:[#allocation6 + $0x298] sm:$0xff]  ;;  %v1431_v62 = vld [vmem:[#allocation9 + $0x108] sm:$0xff] }
 0x2d0   :  { %2106 = vmatpush1.bf16.msra.mxu0 %v2105_v12  ;;  %v2017_v11 = vpack.c.bf16 %v795_v8, %v793_v7  ;;  %v2019_v12 = vpack.c.bf16 %v800_v10, %v798_v9  ;;  %v833_v9 = vld [vmem:[#allocation6 + $0x3a0] sm:$0xff]  ;;  %v835_v10 = vld [vmem:[#allocation6 + $0x3b0] sm:$0xff] }
 0x2d1   :  { %2108 = vmatprep.subr.bf16.mxu0 %v2107_v13  ;;  %v797_v13 = vld [vmem:[#allocation6 + $0x280] sm:$0xff] }
 0x2d2   :  { %v2021_v17 = vpack.c.bf16 %v799_v14, %v797_v13  ;;  %v2057_v13 = vpack.c.bf16 %v835_v10, %v833_v9  ;;  %v1434_v9 = vld [vmem:[#allocation9 + $0x120] sm:$0xff] }
 0x2d4   :  { %2110 = vmatpush1.bf16.msra.mxu0 %v2109_v18  ;;  %v2023_v18 = vpack.c.bf16 %v804_v16, %v802_v15  ;;  %v837_v15 = vld [vmem:[#allocation6 + $0x3c0] sm:$0xff]  ;;  %v839_v16 = vld [vmem:[#allocation6 + $0x3d0] sm:$0xff] }
 0x2d5   :  { %2112 = vmatprep.subr.bf16.mxu0 %v2111_v19  ;;  %v801_v19 = vld [vmem:[#allocation6 + $0x2a0] sm:$0xff] }
 0x2d6   :  { %v2025_v23 = vpack.c.bf16 %v803_v20, %v801_v19  ;;  %v2061_v19 = vpack.c.bf16 %v839_v16, %v837_v15  ;;  %v1436_v15 = vld [vmem:[#allocation9 + $0x130] sm:$0xff] }
 0x2d8   :  { %2114 = vmatpush1.bf16.msra.mxu0 %v2113_v26  ;;  %v807_v26 = vld [vmem:[#allocation6 + $0x2d0] sm:$0xff] }
 0x2d9   :  { %2116 = vmatprep.subr.bf16.mxu0 %v2115_v27  ;;  %v810_v27 = vld [vmem:[#allocation6 + $0x2e8] sm:$0xff] }
 0x2da   :  { %v2031_v30 = vpack.c.bf16 %v812_v28, %v810_v27  ;;  %v1076_v28 = vld [vmem:[#allocation8 + $0x1e8] sm:$0xff] }
 0x2dc   :  { %2118 = vmatpush1.bf16.msra.mxu0 %v2117_v35  ;;  %v816_v35 = vld [vmem:[#allocation6 + $0x318] sm:$0xff] }
 0x2dd   :  { %2120 = vmatprep.subr.bf16.mxu0 %v2119_v37 }
 0x2e0   :  { %2122 = vmatpush1.bf16.msra.mxu0 %v2121_v42  ;;  %v820_v42 = vld [vmem:[#allocation6 + $0x338] sm:$0xff] }
 0x2e1   :  { %2124 = vmatprep.subr.bf16.mxu0 %v2123_v43  ;;  %v2037_v43 = vpack.c.bf16 %v815_v40, %v813_v39  ;;  %v2039_v44 = vpack.c.bf16 %v820_v42, %v818_v41 }
 0x363   :  { %v1728_v24 = vpop.f32.mrb[8].mxu1 }
 0x364   :  { %v682_v25 = vpop.f32.mrb[9].mxu1 }
 0x367   :  { %v1731_v32 = vpop.f32.mrb[10].mxu1 }
 0x368   :  { %v2773_v33 = vmax.f32 %v1728_v24, %v1731_v32  ;;  %v692_v34 = vpop.f32.mrb[11].mxu1  ;;  %v2027_v24 = vpack.c.bf16 %v808_v22, %v806_v21  ;;  %v811_v32 = vld [vmem:[#allocation6 + $0x2f0] sm:$0xff]  ;;  %v841_v21 = vld [vmem:[#allocation6 + $0x3e0] sm:$0xff] }
 0x369   :  { %v2775_v36 = vmax.f32 %v682_v25, %v692_v34  ;;  %v805_v25 = vld [vmem:[#allocation6 + $0x2c0] sm:$0xff]  ;;  %v814_v34 = vld [vmem:[#allocation6 + $0x308] sm:$0xff]  ;;  %v2033_v37 = vpack.c.bf16 %v811_v32, %v809_v31  ;;  %v843_v22 = vld [vmem:[#allocation6 + $0x3f0] sm:$0xff] }
 0x36a   :  { %708 = vst [vmem:[#allocation2 + $0x12] sm:$0xff] %v2773_v33  ;;  %v2029_v29 = vpack.c.bf16 %v807_v26, %v805_v25  ;;  %v2035_v38 = vpack.c.bf16 %v816_v35, %v814_v34  ;;  %v1071_v25 = vld [vmem:[#allocation8 + $0x1c0] sm:$0xff]  ;;  %v1073_v26 = vld [vmem:[#allocation8 + $0x1d0] sm:$0xff] }
 0x36b   :  { %707 = vst [vmem:[#allocation2 + $0x2] sm:$0xff] %v2775_v36  ;;  %v2125_v27 = vpack.c.bf16 %v1073_v26, %v1071_v25  ;;  %v1075_v31 = vld [vmem:[#allocation8 + $0x1e0] sm:$0xff]  ;;  %v1077_v32 = vld [vmem:[#allocation8 + $0x1f0] sm:$0xff]  ;;  %v1457_v26 = vld [vmem:[#allocation9 + $0x1d8] sm:$0xff] }
 0x36c   :  { %v2129_v34 = vpack.c.bf16 %v1077_v32, %v1075_v31  ;;  %v1456_v25 = vld [vmem:[#allocation9 + $0x1d0] sm:$0xff]  ;;  %v1458_v31 = vld [vmem:[#allocation9 + $0x1e0] sm:$0xff]  ;;  %v1459_v32 = vld [vmem:[#allocation9 + $0x1e8] sm:$0xff] }
 0x36d   :  { %2126 = vmatpush1.bf16.msra.mxu0 %v2125_v27  ;;  %v1440_v27 = vld [vmem:[#allocation9 + $0x150] sm:$0xff] }
 0x371   :  { %v712_v59 = vld [vmem:[#allocation2 + $0x11] sm:$0xff] }
 0x372   :  { %v711_v53 = vld [vmem:[#allocation2 + $0x1] sm:$0xff]  ;;  %v710_v0 = vld [vmem:[#allocation2 + $0x10] sm:$0xff] }
 0x373   :  { %v709_v54 = vld [vmem:[#allocation2] sm:$0xff]  ;;  %921 = vmatprep.mubr.f32.mxu1 %v711_v53 }
 0x374   :  { %922 = vmatmul.mubr.f32.vlgmr.msra.gmra.mrb[12].mxu1 %v709_v54  ;;  %v715_v4 = vld [vmem:[#allocation2 + $0x3] sm:$0xff] }
 0x375   :  { %2006 = vmatpush1.bf16.msra.mxu1 %v2005_v48  ;;  %927 = vmatprep.mubr.f32.mxu1 %v712_v59  ;;  %v824_v48 = vld [vmem:[#allocation6 + $0x358] sm:$0xff]  ;;  %v821_v54 = vld [vmem:[#allocation6 + $0x340] sm:$0xff]  ;;  %v2047_v59 = vpack.c.bf16 %v828_v57, %v826_v56  ;;  %v1159_v57 = vld [vmem:[%s2836_s8 + $0x8] sm:$0xff] }
 0x376   :  { %2008 = vmatprep.subr.bf16.mxu1 %v2007_v55  ;;  %v2043_v53 = vpack.c.bf16 %v824_v48, %v822_v47  ;;  %v823_v55 = vld [vmem:[#allocation6 + $0x350] sm:$0xff] }
 0x377   :  { %v2045_v58 = vpack.c.bf16 %v823_v55, %v821_v54 }
 0x378   :  { %928 = vmatmul.mubr.f32.gmra.mrb[14].mxu1 %v710_v0 }
 0x379   :  { %2010 = vmatpush1.bf16.msra.mxu1 %v2009_v60  ;;  %998 = vmatprep.mubr.f32.mxu1 %v715_v4  ;;  %v825_v60 = vld [vmem:[#allocation6 + $0x360] sm:$0xff]  ;;  %v831_v4 = vld [vmem:[#allocation6 + $0x390] sm:$0xff] }
 0x37a   :  { %2012 = vmatprep.subr.bf16.mxu1 %v2011_v61  ;;  %v827_v61 = vld [vmem:[#allocation6 + $0x370] sm:$0xff]  ;;  %v2053_v7 = vpack.c.bf16 %v831_v4, %v829_v3 }
 0x37b   :  { %v2049_v0 = vpack.c.bf16 %v827_v61, %v825_v60  ;;  %v1430_v61 = vld [vmem:[#allocation9 + $0x100] sm:$0xff]  ;;  %v1432_v3 = vld [vmem:[#allocation9 + $0x110] sm:$0xff] }
 0x37c   :  { %v2169_v63 = vpack.c.bf16 %v1431_v62, %v1430_v61  ;;  %v1419_v61 = vld [vmem:[#allocation9 + $0xa8] sm:$0xff] }
 0x37d   :  { %2014 = vmatpush1.bf16.msra.mxu1 %v2013_v5  ;;  %v834_v5 = vld [vmem:[#allocation6 + $0x3a8] sm:$0xff] }
 0x37e   :  { %2016 = vmatprep.subr.bf16.mxu1 %v2015_v6  ;;  %v836_v6 = vld [vmem:[#allocation6 + $0x3b8] sm:$0xff] }
 0x37f   :  { %v2055_v8 = vpack.c.bf16 %v836_v6, %v834_v5  ;;  %v1433_v5 = vld [vmem:[#allocation9 + $0x118] sm:$0xff] }
 0x380   :  { %v2173_v6 = vpack.c.bf16 %v1433_v5, %v1432_v3  ;;  %v1420_v3 = vld [vmem:[#allocation9 + $0xb0] sm:$0xff] }
 0x381   :  { %2018 = vmatpush1.bf16.msra.mxu1 %v2017_v11  ;;  %v838_v11 = vld [vmem:[#allocation6 + $0x3c8] sm:$0xff] }
 0x382   :  { %2020 = vmatprep.subr.bf16.mxu1 %v2019_v12  ;;  %v840_v12 = vld [vmem:[#allocation6 + $0x3d8] sm:$0xff] }
 0x383   :  { %v2059_v14 = vpack.c.bf16 %v840_v12, %v838_v11  ;;  %v1435_v11 = vld [vmem:[#allocation9 + $0x128] sm:$0xff] }
 0x384   :  { %v2177_v12 = vpack.c.bf16 %v1435_v11, %v1434_v9  ;;  %v1423_v9 = vld [vmem:[#allocation9 + $0xc8] sm:$0xff] }
 0x385   :  { %2022 = vmatpush1.bf16.msra.mxu1 %v2021_v17  ;;  %v842_v17 = vld [vmem:[#allocation6 + $0x3e8] sm:$0xff] }
 0x386   :  { %2024 = vmatprep.subr.bf16.mxu1 %v2023_v18  ;;  %v844_v18 = vld [vmem:[#allocation6 + $0x3f8] sm:$0xff] }
 0x387   :  { %v2063_v20 = vpack.c.bf16 %v844_v18, %v842_v17  ;;  %v1437_v17 = vld [vmem:[#allocation9 + $0x138] sm:$0xff] }
 0x388   :  { %v2181_v18 = vpack.c.bf16 %v1437_v17, %v1436_v15  ;;  %v1425_v15 = vld [vmem:[#allocation9 + $0xd8] sm:$0xff] }
 0x389   :  { %2026 = vmatpush1.bf16.msra.mxu1 %v2025_v23  ;;  %v2065_v23 = vpack.c.bf16 %v843_v22, %v841_v21  ;;  %v1438_v21 = vld [vmem:[#allocation9 + $0x140] sm:$0xff] }
 0x38a   :  { %2028 = vmatprep.subr.bf16.mxu1 %v2027_v24  ;;  %v716_v24 = vld [vmem:[#allocation2 + $0x13] sm:$0xff] }
 0x38d   :  { %2030 = vmatpush1.bf16.msra.mxu1 %v2029_v29  ;;  %v1078_v29 = vld [vmem:[#allocation8 + $0x1f8] sm:$0xff] }
 0x38e   :  { %2032 = vmatprep.subr.bf16.mxu1 %v2031_v30  ;;  %v2127_v30 = vpack.c.bf16 %v1078_v29, %v1076_v28  ;;  %v2187_v28 = vpack.c.bf16 %v1457_v26, %v1456_v25  ;;  %v1441_v29 = vld [vmem:[#allocation9 + $0x158] sm:$0xff]  ;;  %v1411_v25 = vld [vmem:[#allocation9 + $0x68] sm:$0xff]  ;;  %v1428_v26 = vld [vmem:[#allocation9 + $0xf0] sm:$0xff] }
 0x390   :  { %2128 = vmatprep.subr.bf16.mxu0 %v2127_v30  ;;  %v2189_v30 = vpack.c.bf16 %v1441_v29, %v1440_v27  ;;  %v1429_v27 = vld [vmem:[#allocation9 + $0xf8] sm:$0xff] }
 0x391   :  { %2034 = vmatpush1.bf16.msra.mxu1 %v2033_v37  ;;  %2130 = vmatpush1.bf16.msra.mxu0 %v2129_v34  ;;  %v1442_v34 = vld [vmem:[#allocation9 + $0x160] sm:$0xff]  ;;  %v2163_v29 = vpack.c.bf16 %v1429_v27, %v1428_v26 }
 0x392   :  { %2036 = vmatprep.subr.bf16.mxu1 %v2035_v38 }
 0x395   :  { %2038 = vmatpush1.bf16.msra.mxu1 %v2037_v43 }
 0x396   :  { %2040 = vmatprep.subr.bf16.mxu1 %v2039_v44 }
 0x399   :  { %2042 = vmatpush1.bf16.msra.mxu1 %v2041_v51 }
 0x39a   :  { %2044 = vmatprep.subr.bf16.mxu1 %v2043_v53 }
 0x39d   :  { %2046 = vmatpush1.bf16.msra.mxu1 %v2045_v58  ;;  %v1446_v58 = vld [vmem:[#allocation9 + $0x180] sm:$0xff] }
 0x39e   :  { %2048 = vmatprep.subr.bf16.mxu1 %v2047_v59  ;;  %v1447_v59 = vld [vmem:[#allocation9 + $0x188] sm:$0xff] }
 0x39f   :  { %v2167_v60 = vpack.c.bf16 %v1447_v59, %v1446_v58  ;;  %v1400_v58 = vld [vmem:[#allocation9 + $0x10] sm:$0xff]  ;;  %v1401_v59 = vld [vmem:[#allocation9 + $0x18] sm:$0xff] }
 0x3a0   :  { %v2141_v62 = vpack.c.bf16 %v1401_v59, %v1400_v58 }
 0x3a1   :  { %2050 = vmatpush1.bf16.msra.mxu1 %v2049_v0  ;;  %v1448_v0 = vld [vmem:[#allocation9 + $0x190] sm:$0xff] }
 0x3a2   :  { %2052 = vmatprep.subr.bf16.mxu1 %v2051_v2  ;;  %v1449_v2 = vld [vmem:[#allocation9 + $0x198] sm:$0xff] }
 0x3a3   :  { %v2171_v4 = vpack.c.bf16 %v1449_v2, %v1448_v0  ;;  %v1402_v0 = vld [vmem:[#allocation9 + $0x20] sm:$0xff]  ;;  %v1403_v2 = vld [vmem:[#allocation9 + $0x28] sm:$0xff] }
 0x3a4   :  { %v2145_v5 = vpack.c.bf16 %v1403_v2, %v1402_v0 }
 0x3a5   :  { %2054 = vmatpush1.bf16.msra.mxu1 %v2053_v7  ;;  %v1450_v7 = vld [vmem:[#allocation9 + $0x1a0] sm:$0xff] }
 0x3a6   :  { %2056 = vmatprep.subr.bf16.mxu1 %v2055_v8  ;;  %v1451_v8 = vld [vmem:[#allocation9 + $0x1a8] sm:$0xff] }
 0x3a7   :  { %v2175_v10 = vpack.c.bf16 %v1451_v8, %v1450_v7  ;;  %v1405_v7 = vld [vmem:[#allocation9 + $0x38] sm:$0xff]  ;;  %v1422_v8 = vld [vmem:[#allocation9 + $0xc0] sm:$0xff] }
 0x3a8   :  { %v2151_v11 = vpack.c.bf16 %v1423_v9, %v1422_v8 }
 0x3a9   :  { %2058 = vmatpush1.bf16.msra.mxu1 %v2057_v13  ;;  %v1452_v13 = vld [vmem:[#allocation9 + $0x1b0] sm:$0xff] }
 0x3aa   :  { %2060 = vmatprep.subr.bf16.mxu1 %v2059_v14  ;;  %v1453_v14 = vld [vmem:[#allocation9 + $0x1b8] sm:$0xff] }
 0x3ab   :  { %v2179_v16 = vpack.c.bf16 %v1453_v14, %v1452_v13  ;;  %v1407_v13 = vld [vmem:[#allocation9 + $0x48] sm:$0xff]  ;;  %v1424_v14 = vld [vmem:[#allocation9 + $0xd0] sm:$0xff] }
 0x3ac   :  { %v2155_v17 = vpack.c.bf16 %v1425_v15, %v1424_v14 }
 0x3ad   :  { %2062 = vmatpush1.bf16.msra.mxu1 %v2061_v19  ;;  %v1454_v19 = vld [vmem:[#allocation9 + $0x1c0] sm:$0xff] }
 0x3ae   :  { %2064 = vmatprep.subr.bf16.mxu1 %v2063_v20  ;;  %v1455_v20 = vld [vmem:[#allocation9 + $0x1c8] sm:$0xff] }
 0x3af   :  { %v2183_v22 = vpack.c.bf16 %v1455_v20, %v1454_v19  ;;  %v1409_v19 = vld [vmem:[#allocation9 + $0x58] sm:$0xff]  ;;  %v1426_v20 = vld [vmem:[#allocation9 + $0xe0] sm:$0xff] }
 0x3b1   :  { %2066 = vmatpush1.bf16.msra.mxu1 %v2065_v23  ;;  %v1439_v23 = vld [vmem:[#allocation9 + $0x148] sm:$0xff] }
 0x3b2   :  { %2168 = vmatprep.subr.bf16.mxu1 %v2167_v60  ;;  %v1418_v60 = vld [vmem:[#allocation9 + $0xa0] sm:$0xff] }
 0x3b4   :  { %999 = vmatmul.mubr.f32.vlgmr.msra.gmra.mrb[12].mxu1 %v2775_v36  ;;  %v845_v36 = vld [vmem:[%s2834_s6] sm:$0x3] }
 0x3b5   :  { %1004 = vmatprep.mubr.f32.mxu1 %v716_v24  ;;  %v850_v35 = vrot.slane %v845_v36, %v248_v50  ;;  %2170 = vmatpush3.bf16.msra.mxu1 %v2169_v63  ;;  %v2185_v24 = vpack.c.bf16 %v1439_v23, %v1438_v21  ;;  %v2143_v63 = vpack.c.bf16 %v1419_v61, %v1418_v60  ;;  %v1427_v21 = vld [vmem:[#allocation9 + $0xe8] sm:$0xff] }
 0x3b6   :  { %2172 = vmatprep.subr.bf16.mxu1 %v2171_v4  ;;  %v1421_v4 = vld [vmem:[#allocation9 + $0xb8] sm:$0xff]  ;;  %v2159_v23 = vpack.c.bf16 %v1427_v21, %v1426_v20 }
 0x3b8   :  { %1005 = vmatmul.mubr.f32.gmra.mrb[14].mxu1 %v2773_v33  ;;  %v854_v33 = vrot.slane %v845_v36, %v252_v52  ;;  %v2191_v36 = vpack.c.bf16 %v1459_v32, %v1458_v31  ;;  %v1413_v31 = vld [vmem:[#allocation9 + $0x78] sm:$0xff] }
 0x3b9   :  { %2174 = vmatpush3.bf16.msra.mxu1 %v2173_v6  ;;  %v1404_v6 = vld [vmem:[#allocation9 + $0x30] sm:$0xff] }
 0x3ba   :  { %2176 = vmatprep.subr.bf16.mxu1 %v2175_v10  ;;  %v2149_v10 = vpack.c.bf16 %v1405_v7, %v1404_v6 }
 0x3bd   :  { %2178 = vmatpush3.bf16.msra.mxu1 %v2177_v12  ;;  %v1406_v12 = vld [vmem:[#allocation9 + $0x40] sm:$0xff] }
 0x3be   :  { %2180 = vmatprep.subr.bf16.mxu1 %v2179_v16  ;;  %v2153_v16 = vpack.c.bf16 %v1407_v13, %v1406_v12 }
 0x3c1   :  { %2182 = vmatpush3.bf16.msra.mxu1 %v2181_v18  ;;  %v1408_v18 = vld [vmem:[#allocation9 + $0x50] sm:$0xff] }
 0x3c2   :  { %2184 = vmatprep.subr.bf16.mxu1 %v2183_v22  ;;  %v2157_v22 = vpack.c.bf16 %v1409_v19, %v1408_v18 }
 0x3c5   :  { %2186 = vmatpush3.bf16.msra.mxu1 %v2185_v24  ;;  %v1410_v24 = vld [vmem:[#allocation9 + $0x60] sm:$0xff] }
 0x3c6   :  { %2188 = vmatprep.subr.bf16.mxu1 %v2187_v28  ;;  %v2161_v28 = vpack.c.bf16 %v1411_v25, %v1410_v24 }
 0x3c9   :  { %2190 = vmatpush3.bf16.msra.mxu1 %v2189_v30  ;;  %v1412_v30 = vld [vmem:[#allocation9 + $0x70] sm:$0xff] }
 0x3ca   :  { %2192 = vmatprep.subr.bf16.mxu1 %v2191_v36  ;;  %v2165_v32 = vpack.c.bf16 %v1413_v31, %v1412_v30  ;;  %v1461_v36 = vld [vmem:[#allocation9 + $0x1f8] sm:$0xff] }
 0x487   :  { %v1000_v37 = vpop.f32.mrb[12].mxu1 }
 0x488   :  { %v2207_v38 = vadd.f32 %v1000_v37, %v850_v35  ;;  %v1002_v39 = vpop.f32.mrb[13].mxu1 }
 0x489   :  { %v2208_v40 = vadd.f32 %v1002_v39, %v854_v33  ;;  %v1245_v39 = vld [vmem:[%s2837_s9 + $0x8] sm:$0xff] }
 0x48a   :  { %v1011_v43 = vmax.f32 %v2207_v38, 0.0 }
 0x48b   :  { %v1012_v41 = vmax.f32 %v2208_v40, 0.0  ;;  %v1006_v42 = vpop.f32.mrb[14].mxu1  ;;  %v1244_v40 = vld [vmem:[%s2837_s9] sm:$0xff] }
 0x48c   :  { %v2209_v44 = vadd.f32 %v1006_v42, %v850_v35  ;;  %v1008_v45 = vpop.f32.mrb[15].mxu1  ;;  %v1443_v35 = vld [vmem:[#allocation9 + $0x168] sm:$0xff]  ;;  %v1247_v42 = vld [vmem:[%s2837_s9 + $0x18] sm:$0xff] }
 0x48d   :  { %v2210_v46 = vadd.f32 %v1008_v45, %v854_v33  ;;  %1143 = vmatprep.mubr.f32.mxu0 %v1012_v41  ;;  %v2193_v33 = vpack.c.bf16 %v1443_v35, %v1442_v34  ;;  %v1460_v34 = vld [vmem:[#allocation9 + $0x1f0] sm:$0xff] }
 0x48e   :  { %1144 = vmatmul.mubr.f32.vlgmr.msra.gmra.mrb[8].mxu0 %v1011_v43  ;;  %v1013_v48 = vmax.f32 %v2209_v44, 0.0  ;;  %v1414_v43 = vld [vmem:[#allocation9 + $0x80] sm:$0xff]  ;;  %v1415_v44 = vld [vmem:[#allocation9 + $0x88] sm:$0xff]  ;;  %v2195_v35 = vpack.c.bf16 %v1461_v36, %v1460_v34 }
 0x48f   :  { %v1014_v47 = vmax.f32 %v2210_v46, 0.0  ;;  %2194 = vmatpush3.bf16.msra.mxu1 %v2193_v33  ;;  %v1444_v33 = vld [vmem:[#allocation9 + $0x170] sm:$0xff] }
 0x490   :  { %2196 = vmatprep.subr.bf16.mxu1 %v2195_v35 }
 0x491   :  { %1149 = vmatprep.mubr.f32.mxu0 %v1014_v47  ;;  %v1246_v47 = vld [vmem:[%s2837_s9 + $0x10] sm:$0xff] }
 0x492   :  { %1150 = vmatmul.mubr.f32.gmra.mrb[10].mxu0 %v1013_v48  ;;  %v1243_v48 = vld [vmem:[%s2838_s10] sm:$0x3] }
 0x493   :  { %1736 = vmatprep.mubr.msk.f32.mxu0 %vm1160_vm1, %v1158_v49 }
 0x561   :  { %v1145_v50 = vpop.f32.mrb[8].mxu0 }
 0x562   :  { %v1147_v52 = vpop.f32.mrb[9].mxu0 }
 0x563   :  { %v1156_v51 = vmax.f32 %v1145_v50, %v1147_v52  ;;  %v2135_v50 = vpack.c.bf16 %v1415_v44, %v1414_v43  ;;  %v1398_v52 = vld [vmem:[#allocation9] sm:$0xff] }
 0x565   :  { %v1151_v53 = vpop.f32.mrb[10].mxu0 }
 0x566   :  { %v1153_v54 = vpop.f32.mrb[11].mxu0 }
 0x567   :  { %v1157_v55 = vmax.f32 %v1151_v53, %v1153_v54  ;;  %v1416_v54 = vld [vmem:[#allocation9 + $0x90] sm:$0xff] }
 0x569   :  { %v2131_v56 = vpack.c.bf16 %v1157_v55, %v1156_v51  ;;  %v1399_v51 = vld [vmem:[#allocation9 + $0x8] sm:$0xff]  ;;  %v1417_v55 = vld [vmem:[#allocation9 + $0x98] sm:$0xff] }
 0x56b   :  { %2132 = vmatprep.subr.bf16.mxu0 %v2131_v56 }
 0x56c   :  { %2134 = vmatpush3.bf16.msra.mxu0 %v2131_v56  ;;  %v2137_v56 = vpack.c.bf16 %v1399_v51, %v1398_v52 }
 0x56f   :  { %1737 = vmatmul.mubr.msk.f32.vlgmr.msra.gmra.mrb[12].mxu0 %vm1160_vm1, %v1159_v57  ;;  %v2139_v57 = vpack.c.bf16 %v1417_v55, %v1416_v54 }
 0x570   :  { %1320 = vmatprep.mubr.f32.mxu0 %v2359_v1 }
 0x642   :  { %v1738_v37 = vpop.f32.mrb[12].mxu0 }
 0x643   :  { %v1233_v38 = vpop.f32.mrb[13].mxu0 }
 0x644   :  { %v1242_v41 = vmax.f32 %v1233_v38, %v1738_v37  ;;  %v1445_v37 = vld [vmem:[#allocation9 + $0x178] sm:$0xff] }
 0x645   :  { %v2197_v38 = vpack.c.bf16 %v1445_v37, %v1444_v33 }
 0x646   :  { %v1249_v45 = vmul.f32 %v1245_v39, %v1242_v41  ;;  %v1248_v46 = vmul.f32 %v1244_v40, %v1242_v41  ;;  %v1251_v49 = vmul.f32 %v1247_v42, %v1242_v41  ;;  %v1250_v53 = vmul.f32 %v1246_v47, %v1242_v41 }
 0x647   :  { %2198 = vmatpush3.bf16.msra.mxu1 %v2197_v38 }
 0x648   :  { %1256 = vmatprep.subr.mxu0 %v1249_v45 }
 0x649   :  { %1257 = vmatpush1.msra.mxu0 %v1248_v46  ;;  %v1635_v46 = vld [vmem:[%s2840_s12] ss:$0 sm:$0xff] }
 0x64a   :  { %1633 = vmatmul.mubr.msk.f32.vlgmr.msra.gmra.mrb[14].mxu0 %vm1252_vm2, %v1243_v48  ;;  %1327 = vmatprep.subr.mxu0 %v1251_v49 }
 0x64b   :  { %1328 = vmatpush1.msra.mxu0 %v1250_v53  ;;  %1391 = vmatprep.mubr.f32.mxu0 %v2359_v1  ;;  %v2147_v1 = vpack.c.bf16 %v1421_v4, %v1420_v3 }
 0x64c   :  { %2136 = vmatprep.subr.bf16.mxu0 %v2135_v50 }
 0x64e   :  { %1634 = vmatmul.mubr.msk.f32.vlgmr.msra.gmra.mrb[16].mxu0 %vm1252_vm2, %v1243_v48 }
 0x64f   :  { %2138 = vmatpush3.bf16.msra.mxu0 %v2137_v56 }
 0x650   :  { %2140 = vmatprep.subr.bf16.mxu0 %v2139_v57 }
 0x653   :  { %2142 = vmatpush3.bf16.msra.mxu0 %v2141_v62 }
 0x654   :  { %2144 = vmatprep.subr.bf16.mxu0 %v2143_v63 }
 0x657   :  { %2146 = vmatpush3.bf16.msra.mxu0 %v2145_v5 }
 0x658   :  { %2148 = vmatprep.subr.bf16.mxu0 %v2147_v1 }
 0x65b   :  { %2150 = vmatpush3.bf16.msra.mxu0 %v2149_v10 }
 0x65c   :  { %2152 = vmatprep.subr.bf16.mxu0 %v2151_v11 }
 0x65f   :  { %2154 = vmatpush3.bf16.msra.mxu0 %v2153_v16 }
 0x660   :  { %2156 = vmatprep.subr.bf16.mxu0 %v2155_v17 }
 0x663   :  { %2158 = vmatpush3.bf16.msra.mxu0 %v2157_v22 }
 0x664   :  { %2160 = vmatprep.subr.bf16.mxu0 %v2159_v23 }
 0x667   :  { %2162 = vmatpush3.bf16.msra.mxu0 %v2161_v28 }
 0x668   :  { %2164 = vmatprep.subr.bf16.mxu0 %v2163_v29 }
 0x66b   :  { %2166 = vmatpush3.bf16.msra.mxu0 %v2165_v32 }
 0x71d   :  { %v1322_v39 = vpop.f32.mrb[14].mxu0 }
 0x71e   :  { %v1324_v40 = vpop.f32.mrb[15].mxu0 }
 0x71f   :  { %1533 = vmatprep.mubr.f32.mxu0 %v1324_v40 }
 0x720   :  { %1534 = vmatmul.mubr.f32.vlgmr.msra.gmra.mrb[18].mxu0 %v1322_v39 }
 0x721   :  { %v1393_v41 = vpop.f32.mrb[16].mxu0 }
 0x722   :  { %v1395_v42 = vpop.f32.mrb[17].mxu0 }
 0x723   :  { %1603 = vmatprep.mubr.f32.mxu1 %v1395_v42 }
 0x724   :  { %1604 = vmatmul.mubr.f32.vlgmr.msra.gmra.mrb[16].mxu1 %v1393_v41 }
 0x7f3   :  { %v1680_v43 = vpop.f32.mrb[18].mxu0 }
 0x7f4   :  { %v1681_v44 = vpop.f32.mrb[19].mxu0 }
 0x7f5   :  { %v1682_v45 = vadd.f32 %v1681_v44, %v1680_v43 }
 0x7f7   :  { %v1715_v47 = vpop.f32.mrb[16].mxu1  ;;  %v1536_v49 = vadd.f32 %v1682_v45, %v1635_v46 }
 0x7f8   :  { %v1716_v48 = vpop.f32.mrb[17].mxu1 }
 0x7f9   :  { %v1717_v50 = vadd.f32 %v1716_v48, %v1715_v47 }
 0x7fb   :  { %v1606_v52 = vadd.f32 %v1717_v50, %v1536_v49 }
 0x7fd   :  { %1609 = vst [vmem:[#allocation11] sm:$0x3] %v1606_v52 }
 0x7fe   :  { %2332 = shalt.err (!%p2329_p8)
}
 0x7ff   :  { %s2333_s12 = scalar_lea.hbm %s2841_s13, 32 }
 0x800   :  { %p2334_p9 = scmp.ne.s32.totalorder %s2841_s13, %s2333_s12  ;;  %p2337_p10 = scmp.lt.u32.totalorder %s2333_s12, %s2841_s13 }
 0x802   :  { %p2339_p11 = pnand %p2337_p10, %p2334_p9 }
 0x804   :  { %2342 = shalt.err (!%p2339_p11)
}
 0x805   :  { %1619 = dma.vmem_to_hbm [thread:$0]  %s1617_s17, 32, %s2841_s13, [#allocation5]  }
 0x806   :  { %2349 = dma.done.wait [#allocation5], 32  }
 0x807   :  { %2350 = vsyncadd [#allocation5], 4294967264 }
 0x808   :  { %1623 = vsyncpa [#allocation4], 1 }
 0x809   :  { %1624 = vsyncpa [#allocation7], 1 }
 0x80a   :  { %1625 = vsyncpa [#allocation10], 1 }
 0x80b   :  { %1626 = vsyncpa [#allocation5], 1 }

</bundles_post_ra>
